<compile_context>
chip_gen: v5e
topology: v5e:2x2
jax: 0.10.0
libtpu: 0.0.40
codegen_flags: <defaults>
</compile_context>

<pallas_src>
import functools

import jax
import jax.numpy as jnp
from jax.experimental import pallas as pl
from jax.experimental.pallas import tpu as pltpu


def _round_up(n, m):
    return ((n + m - 1) // m) * m


# ----------------------------------------------------------------------------
# Fused kernel: all layers + time recurrence + linear head, single invocation.
# ----------------------------------------------------------------------------
def _fused_lstm_kernel(*refs, num_layers, seq_len, batch, hidden, batch_pad):
    """Ref layout (inputs, then outputs, then scratch):

      refs[0]               x_ref     (T*Bp, D)   time-major, sublane-padded
      refs[1 + 3l + 0]      w_ih_t    (D_l, 4H)
      refs[1 + 3l + 1]      w_hh_t    (H, 4H)
      refs[1 + 3l + 2]      bias      (1, 4H)     b_ih + b_hh
      refs[1 + 3L]          w_out     (1, H)
      refs[2 + 3L]          b_out     (1, 1)
      refs[3 + 3L]          o_ref     (B, 1)      output
      refs[4 + 3L]          hseq_ref  (T*Bp, H)   VMEM scratch (inter-layer seq)
    """
    T, B, H, Bp, L = seq_len, batch, hidden, batch_pad, num_layers
    x_ref = refs[0]
    w_refs = refs[1:1 + 3 * L]
    w_out_ref = refs[1 + 3 * L]
    b_out_ref = refs[2 + 3 * L]
    o_ref = refs[3 + 3 * L]
    hseq_ref = refs[4 + 3 * L]

    # Zero the staging scratch once (defensive: padded rows [B, Bp) stay zero).
    hseq_ref[...] = jnp.zeros_like(hseq_ref)

    # Hoisted lane mask for the gate selector (JAX does not CSE broadcasts, so
    # build it once instead of once per cell).
    lane = jax.lax.broadcasted_iota(jnp.int32, (B, 4 * H), 1)
    is_g = jnp.logical_and(lane >= 2 * H, lane < 3 * H)

    def cell(gates, h_prev, c_prev):
        # gates: (B, 4H) pre-activations, PyTorch order [i | f | g | o].
        # Route sigmoid through tanh (sigmoid(x) = 0.5*(1 + tanh(x/2))) so a
        # single full-width tanh pass feeds the EUP: 4H elems/cell, not 8H.
        pre = jnp.where(is_g, gates, 0.5 * gates)
        th = jnp.tanh(pre)
        act = jnp.where(is_g, th, 0.5 * th + 0.5)
        i_g = act[:, 0 * H:1 * H]
        f_g = act[:, 1 * H:2 * H]
        g_g = act[:, 2 * H:3 * H]
        o_g = act[:, 3 * H:4 * H]
        c_new = f_g * c_prev + i_g * g_g
        h_new = o_g * jnp.tanh(c_new)
        return h_new, c_new

    h = None
    for layer in range(L):
        w_ih = w_refs[3 * layer][...]        # (D_in, 4H)
        w_hh = w_refs[3 * layer + 1][...]    # (H, 4H)
        bias = w_refs[3 * layer + 2][...]    # (1, 4H)

        # ---- input projection (independent of the h/c recurrence) ----------
        # One well-shaped (T*Bp, D_in) x (D_in, 4H) matmul per layer; rows for
        # padded batch entries are garbage/zero and are simply never sliced.
        src = x_ref[...] if layer == 0 else hseq_ref[...]
        gx_all = jnp.dot(src, w_ih, preferred_element_type=jnp.float32) + bias
        gx = [gx_all[t * Bp:t * Bp + B, :] for t in range(T)]

        # ---- serial recurrence (statically unrolled) ------------------------
        h = jnp.zeros((B, H), jnp.float32)
        c = jnp.zeros((B, H), jnp.float32)
        is_last_layer = layer == L - 1
        for t in range(T):
            gates = gx[t] + jnp.dot(h, w_hh, preferred_element_type=jnp.float32)
            h, c = cell(gates, h, c)
            if not is_last_layer:
                # Stage h_t for the next layer (sublane-aligned row stride Bp);
                # the last layer's per-step outputs are never materialized.
                hseq_ref[t * Bp:t * Bp + B, :] = h

    # ---- Linear head on the last layer's final hidden state -----------------
    # y = h @ W_out^T + b computed as a VPU multiply + lane reduction rather
    # than an N=1 MXU matmul with a 1-lane result path.
    y = jnp.sum(h * w_out_ref[...], axis=-1, keepdims=True) + b_out_ref[...]
    o_ref[...] = y


# ----------------------------------------------------------------------------
# Wrapper
# ----------------------------------------------------------------------------
def lstm_regression_forward(params, x):
    """x: (B, T, D) batch_first, like the PyTorch module. Returns (B, 1)."""
    # TODO(synk): optional (h_0, c_0) inputs not plumbed; this implements the
    # module's default zero-initial-state path (hidden_state=None).
    B, T, D = x.shape
    layers = params["layers"]
    L = len(layers)
    H = layers[0]["w_hh_t"].shape[0]
    Bp = _round_up(B, 8)   # sublane-aligned row stride for time-major staging

    # Tiny host-side transpose + pad to time-major with sublane-aligned row
    # stride, so every layer's input projection is ONE (T*Bp, D_in) x (D_in,4H)
    # matmul and every in-kernel timestep access is a static aligned slice.
    x_tm = jnp.transpose(x.astype(jnp.float32), (1, 0, 2))   # (T, B, D)
    if Bp != B:
        x_tm = jnp.pad(x_tm, ((0, 0), (0, Bp - B), (0, 0)))
    x_flat = x_tm.reshape(T * Bp, D)

    flat_w = []
    for lp in layers:
        flat_w += [lp["w_ih_t"], lp["w_hh_t"], lp["bias"]]
    flat_w += [params["w_out"], params["b_out"]]

    kernel = functools.partial(
        _fused_lstm_kernel,
        num_layers=L, seq_len=T, batch=B, hidden=H, batch_pad=Bp)

    # No grid: the kernel runs once with every (tiny) operand VMEM-resident.
    return pl.pallas_call(
        kernel,
        out_shape=jax.ShapeDtypeStruct((B, 1), jnp.float32),
        scratch_shapes=[pltpu.VMEM((T * Bp, H), jnp.float32)],
    )(x_flat, *flat_w)


# ----------------------------------------------------------------------------
# Parameter init (PyTorch-shaped, uniform +-1/sqrt(H)), stored pre-transposed.
# ----------------------------------------------------------------------------
def init_params(key, input_dim, hidden, num_layers):
    k = 1.0 / jnp.sqrt(jnp.float32(hidden))
    params = {"layers": []}
    for layer in range(num_layers):
        d_in = input_dim if layer == 0 else hidden
        key, k1, k2, k3, k4 = jax.random.split(key, 5)
        w_ih = jax.random.uniform(k1, (4 * hidden, d_in), jnp.float32, -k, k)
        w_hh = jax.random.uniform(k2, (4 * hidden, hidden), jnp.float32, -k, k)
        b_ih = jax.random.uniform(k3, (4 * hidden,), jnp.float32, -k, k)
        b_hh = jax.random.uniform(k4, (4 * hidden,), jnp.float32, -k, k)
        params["layers"].append({
            "w_ih_t": jnp.transpose(w_ih),                    # (d_in, 4H)
            "w_hh_t": jnp.transpose(w_hh),                    # (H, 4H)
            "bias": (b_ih + b_hh).reshape(1, 4 * hidden),     # (1, 4H)
        })
    key, k1, k2 = jax.random.split(key, 3)
    params["w_out"] = jax.random.uniform(k1, (1, hidden), jnp.float32, -k, k)
    params["b_out"] = jax.random.uniform(k2, (1, 1), jnp.float32, -k, k)
    return params


# ----------------------------------------------------------------------------
# Pure-JAX reference (for correctness check)
# ----------------------------------------------------------------------------
def reference_forward(params, x):
    x_seq = jnp.transpose(x, (1, 0, 2)).astype(jnp.float32)   # (T, B, D)
    for lp in params["layers"]:
        H = lp["w_hh_t"].shape[0]
        B = x_seq.shape[1]

        def step(carry, x_t, lp=lp, H=H):
            h, c = carry
            gates = x_t @ lp["w_ih_t"] + h @ lp["w_hh_t"] + lp["bias"]
            i = jax.nn.sigmoid(gates[:, :H])
            f = jax.nn.sigmoid(gates[:, H:2 * H])
            g = jnp.tanh(gates[:, 2 * H:3 * H])
            o = jax.nn.sigmoid(gates[:, 3 * H:])
            c_new = f * c + i * g
            h_new = o * jnp.tanh(c_new)
            return (h_new, c_new), h_new

        init = (jnp.zeros((B, H), jnp.float32), jnp.zeros((B, H), jnp.float32))
        (_, _), hs = jax.lax.scan(step, init, x_seq)
        x_seq = hs
    return x_seq[-1] @ params["w_out"].T + params["b_out"]


if __name__ == "__main__":
    # Small shapes implied by the module's forward: x is (batch, seq_len, input_dim)
    B, T, D, H, L = 2, 8, 8, 32, 2

    key = jax.random.PRNGKey(0)
    key, kx, kp = jax.random.split(key, 3)
    x = jax.random.normal(kx, (B, T, D), jnp.float32)
    params = init_params(kp, input_dim=D, hidden=H, num_layers=L)

    y = lstm_regression_forward(params, x)
    y = jax.block_until_ready(y)

    y_ref = reference_forward(params, x)
    assert y.shape == (B, 1)
    assert jnp.allclose(y, y_ref, atol=1e-4, rtol=1e-4), (y, y_ref)

    print("KERNEL_OK")
</pallas_src>

<mosaic_0001>
module attributes {stable_mosaic.version = 11 : i64} {
  func.func @_fused_lstm_kernel(%arg0: memref<64x8xf32, #tpu.memory_space<vmem>>, %arg1: memref<8x128xf32, #tpu.memory_space<vmem>>, %arg2: memref<32x128xf32, #tpu.memory_space<vmem>>, %arg3: memref<1x128xf32, #tpu.memory_space<vmem>>, %arg4: memref<32x128xf32, #tpu.memory_space<vmem>>, %arg5: memref<32x128xf32, #tpu.memory_space<vmem>>, %arg6: memref<1x128xf32, #tpu.memory_space<vmem>>, %arg7: memref<1x32xf32, #tpu.memory_space<vmem>>, %arg8: memref<1x1xf32, #tpu.memory_space<vmem>>, %arg9: memref<2x1xf32, #tpu.memory_space<vmem>>, %arg10: memref<64x32xf32, #tpu.memory_space<vmem>>) attributes {dimension_semantics = [], scalar_prefetch = 0 : i64, scratch_operands = 1 : i64, tpu.core_type = #tpu.core_type<tc>} {
    %cst = arith.constant 0.000000e+00 : f32
    %0 = vector.broadcast %cst : f32 to vector<64x32xf32>
    %c0 = arith.constant 0 : index
    %c0_0 = arith.constant 0 : index
    %1 = vector.load %arg10[%c0, %c0_0] : memref<64x32xf32, #tpu.memory_space<vmem>>, vector<64x32xf32>
    tpu.vector_store %arg10[%c0, %c0_0], %0 {strides = array<i32>} : memref<64x32xf32, #tpu.memory_space<vmem>>, vector<64x32xf32>,
    %2 = tpu.iota {dimensions = array<i32: 1>} : vector<2x128xi32>
    %c64_i32 = arith.constant 64 : i32
    %3 = vector.broadcast %c64_i32 : i32 to vector<2x128xi32>
    %4 = arith.cmpi sge, %2, %3 : vector<2x128xi32>
    %c96_i32 = arith.constant 96 : i32
    %5 = vector.broadcast %c96_i32 : i32 to vector<2x128xi32>
    %6 = arith.cmpi slt, %2, %5 : vector<2x128xi32>
    %7 = arith.andi %4, %6 : vector<2x128xi1>
    %c0_1 = arith.constant 0 : index
    %c0_2 = arith.constant 0 : index
    %8 = vector.load %arg1[%c0_1, %c0_2] : memref<8x128xf32, #tpu.memory_space<vmem>>, vector<8x128xf32>
    %c0_3 = arith.constant 0 : index
    %c0_4 = arith.constant 0 : index
    %9 = vector.load %arg2[%c0_3, %c0_4] : memref<32x128xf32, #tpu.memory_space<vmem>>, vector<32x128xf32>
    %c0_5 = arith.constant 0 : index
    %c0_6 = arith.constant 0 : index
    %10 = vector.load %arg3[%c0_5, %c0_6] : memref<1x128xf32, #tpu.memory_space<vmem>>, vector<1x128xf32>
    %c0_7 = arith.constant 0 : index
    %c0_8 = arith.constant 0 : index
    %11 = vector.load %arg0[%c0_7, %c0_8] : memref<64x8xf32, #tpu.memory_space<vmem>>, vector<64x8xf32>
    %cst_9 = arith.constant dense<0.000000e+00> : vector<64x128xf32>
    %12 = tpu.matmul %11, %8, %cst_9 {dimension_numbers = #tpu.dot_dimension_numbers<[1], [0], [0], [1], [0, 0, 1, 1], [], []>} : vector<64x8xf32>, vector<8x128xf32>, vector<64x128xf32> -> vector<64x128xf32>
    %13 = vector.broadcast %10 : vector<1x128xf32> to vector<64x128xf32>
    %14 = arith.addf %12, %13 : vector<64x128xf32>
    %15 = vector.extract_strided_slice %14 {offsets = [0, 0], sizes = [2, 128], strides = [1, 1]} : vector<64x128xf32> to vector<2x128xf32>
    %16 = vector.extract_strided_slice %14 {offsets = [8, 0], sizes = [2, 128], strides = [1, 1]} : vector<64x128xf32> to vector<2x128xf32>
    %17 = vector.extract_strided_slice %14 {offsets = [16, 0], sizes = [2, 128], strides = [1, 1]} : vector<64x128xf32> to vector<2x128xf32>
    %18 = vector.extract_strided_slice %14 {offsets = [24, 0], sizes = [2, 128], strides = [1, 1]} : vector<64x128xf32> to vector<2x128xf32>
    %19 = vector.extract_strided_slice %14 {offsets = [32, 0], sizes = [2, 128], strides = [1, 1]} : vector<64x128xf32> to vector<2x128xf32>
    %20 = vector.extract_strided_slice %14 {offsets = [40, 0], sizes = [2, 128], strides = [1, 1]} : vector<64x128xf32> to vector<2x128xf32>
    %21 = vector.extract_strided_slice %14 {offsets = [48, 0], sizes = [2, 128], strides = [1, 1]} : vector<64x128xf32> to vector<2x128xf32>
    %22 = vector.extract_strided_slice %14 {offsets = [56, 0], sizes = [2, 128], strides = [1, 1]} : vector<64x128xf32> to vector<2x128xf32>
    %cst_10 = arith.constant 0.000000e+00 : f32
    %23 = vector.broadcast %cst_10 : f32 to vector<2x32xf32>
    %cst_11 = arith.constant 0.000000e+00 : f32
    %24 = vector.broadcast %cst_11 : f32 to vector<2x32xf32>
    %cst_12 = arith.constant dense<0.000000e+00> : vector<2x128xf32>
    %25 = tpu.matmul %23, %9, %cst_12 {dimension_numbers = #tpu.dot_dimension_numbers<[1], [0], [0], [1], [0, 0, 1, 1], [], []>} : vector<2x32xf32>, vector<32x128xf32>, vector<2x128xf32> -> vector<2x128xf32>
    %26 = arith.addf %15, %25 : vector<2x128xf32>
    %cst_13 = arith.constant 5.000000e-01 : f32
    %27 = vector.broadcast %cst_13 : f32 to vector<2x128xf32>
    %28 = arith.mulf %27, %26 : vector<2x128xf32>
    %29 = arith.select %7, %26, %28 : vector<2x128xi1>, vector<2x128xf32>
    %30 = math.tanh %29 : vector<2x128xf32>
    %cst_14 = arith.constant 5.000000e-01 : f32
    %31 = vector.broadcast %cst_14 : f32 to vector<2x128xf32>
    %32 = arith.mulf %31, %30 : vector<2x128xf32>
    %cst_15 = arith.constant 5.000000e-01 : f32
    %33 = vector.broadcast %cst_15 : f32 to vector<2x128xf32>
    %34 = arith.addf %32, %33 : vector<2x128xf32>
    %35 = arith.select %7, %30, %34 : vector<2x128xi1>, vector<2x128xf32>
    %36 = vector.extract_strided_slice %35 {offsets = [0, 0], sizes = [2, 32], strides = [1, 1]} : vector<2x128xf32> to vector<2x32xf32>
    %37 = vector.extract_strided_slice %35 {offsets = [0, 32], sizes = [2, 32], strides = [1, 1]} : vector<2x128xf32> to vector<2x32xf32>
    %38 = vector.extract_strided_slice %35 {offsets = [0, 64], sizes = [2, 32], strides = [1, 1]} : vector<2x128xf32> to vector<2x32xf32>
    %39 = vector.extract_strided_slice %35 {offsets = [0, 96], sizes = [2, 32], strides = [1, 1]} : vector<2x128xf32> to vector<2x32xf32>
    %40 = arith.mulf %37, %24 : vector<2x32xf32>
    %41 = arith.mulf %36, %38 : vector<2x32xf32>
    %42 = arith.addf %40, %41 : vector<2x32xf32>
    %43 = math.tanh %42 : vector<2x32xf32>
    %44 = arith.mulf %39, %43 : vector<2x32xf32>
    %c0_16 = arith.constant 0 : index
    %c0_17 = arith.constant 0 : index
    %45 = vector.load %arg10[%c0_16, %c0_17] : memref<64x32xf32, #tpu.memory_space<vmem>>, vector<2x32xf32>
    tpu.vector_store %arg10[%c0_16, %c0_17], %44 {strides = array<i32>} : memref<64x32xf32, #tpu.memory_space<vmem>>, vector<2x32xf32>,
    %cst_18 = arith.constant dense<0.000000e+00> : vector<2x128xf32>
    %46 = tpu.matmul %44, %9, %cst_18 {dimension_numbers = #tpu.dot_dimension_numbers<[1], [0], [0], [1], [0, 0, 1, 1], [], []>} : vector<2x32xf32>, vector<32x128xf32>, vector<2x128xf32> -> vector<2x128xf32>
    %47 = arith.addf %16, %46 : vector<2x128xf32>
    %cst_19 = arith.constant 5.000000e-01 : f32
    %48 = vector.broadcast %cst_19 : f32 to vector<2x128xf32>
    %49 = arith.mulf %48, %47 : vector<2x128xf32>
    %50 = arith.select %7, %47, %49 : vector<2x128xi1>, vector<2x128xf32>
    %51 = math.tanh %50 : vector<2x128xf32>
    %cst_20 = arith.constant 5.000000e-01 : f32
    %52 = vector.broadcast %cst_20 : f32 to vector<2x128xf32>
    %53 = arith.mulf %52, %51 : vector<2x128xf32>
    %cst_21 = arith.constant 5.000000e-01 : f32
    %54 = vector.broadcast %cst_21 : f32 to vector<2x128xf32>
    %55 = arith.addf %53, %54 : vector<2x128xf32>
    %56 = arith.select %7, %51, %55 : vector<2x128xi1>, vector<2x128xf32>
    %57 = vector.extract_strided_slice %56 {offsets = [0, 0], sizes = [2, 32], strides = [1, 1]} : vector<2x128xf32> to vector<2x32xf32>
    %58 = vector.extract_strided_slice %56 {offsets = [0, 32], sizes = [2, 32], strides = [1, 1]} : vector<2x128xf32> to vector<2x32xf32>
    %59 = vector.extract_strided_slice %56 {offsets = [0, 64], sizes = [2, 32], strides = [1, 1]} : vector<2x128xf32> to vector<2x32xf32>
    %60 = vector.extract_strided_slice %56 {offsets = [0, 96], sizes = [2, 32], strides = [1, 1]} : vector<2x128xf32> to vector<2x32xf32>
    %61 = arith.mulf %58, %42 : vector<2x32xf32>
    %62 = arith.mulf %57, %59 : vector<2x32xf32>
    %63 = arith.addf %61, %62 : vector<2x32xf32>
    %64 = math.tanh %63 : vector<2x32xf32>
    %65 = arith.mulf %60, %64 : vector<2x32xf32>
    %c8 = arith.constant 8 : index
    %c0_22 = arith.constant 0 : index
    %66 = vector.load %arg10[%c8, %c0_22] : memref<64x32xf32, #tpu.memory_space<vmem>>, vector<2x32xf32>
    tpu.vector_store %arg10[%c8, %c0_22], %65 {strides = array<i32>} : memref<64x32xf32, #tpu.memory_space<vmem>>, vector<2x32xf32>,
    %cst_23 = arith.constant dense<0.000000e+00> : vector<2x128xf32>
    %67 = tpu.matmul %65, %9, %cst_23 {dimension_numbers = #tpu.dot_dimension_numbers<[1], [0], [0], [1], [0, 0, 1, 1], [], []>} : vector<2x32xf32>, vector<32x128xf32>, vector<2x128xf32> -> vector<2x128xf32>
    %68 = arith.addf %17, %67 : vector<2x128xf32>
    %cst_24 = arith.constant 5.000000e-01 : f32
    %69 = vector.broadcast %cst_24 : f32 to vector<2x128xf32>
    %70 = arith.mulf %69, %68 : vector<2x128xf32>
    %71 = arith.select %7, %68, %70 : vector<2x128xi1>, vector<2x128xf32>
    %72 = math.tanh %71 : vector<2x128xf32>
    %cst_25 = arith.constant 5.000000e-01 : f32
    %73 = vector.broadcast %cst_25 : f32 to vector<2x128xf32>
    %74 = arith.mulf %73, %72 : vector<2x128xf32>
    %cst_26 = arith.constant 5.000000e-01 : f32
    %75 = vector.broadcast %cst_26 : f32 to vector<2x128xf32>
    %76 = arith.addf %74, %75 : vector<2x128xf32>
    %77 = arith.select %7, %72, %76 : vector<2x128xi1>, vector<2x128xf32>
    %78 = vector.extract_strided_slice %77 {offsets = [0, 0], sizes = [2, 32], strides = [1, 1]} : vector<2x128xf32> to vector<2x32xf32>
    %79 = vector.extract_strided_slice %77 {offsets = [0, 32], sizes = [2, 32], strides = [1, 1]} : vector<2x128xf32> to vector<2x32xf32>
    %80 = vector.extract_strided_slice %77 {offsets = [0, 64], sizes = [2, 32], strides = [1, 1]} : vector<2x128xf32> to vector<2x32xf32>
    %81 = vector.extract_strided_slice %77 {offsets = [0, 96], sizes = [2, 32], strides = [1, 1]} : vector<2x128xf32> to vector<2x32xf32>
    %82 = arith.mulf %79, %63 : vector<2x32xf32>
    %83 = arith.mulf %78, %80 : vector<2x32xf32>
    %84 = arith.addf %82, %83 : vector<2x32xf32>
    %85 = math.tanh %84 : vector<2x32xf32>
    %86 = arith.mulf %81, %85 : vector<2x32xf32>
    %c16 = arith.constant 16 : index
    %c0_27 = arith.constant 0 : index
    %87 = vector.load %arg10[%c16, %c0_27] : memref<64x32xf32, #tpu.memory_space<vmem>>, vector<2x32xf32>
    tpu.vector_store %arg10[%c16, %c0_27], %86 {strides = array<i32>} : memref<64x32xf32, #tpu.memory_space<vmem>>, vector<2x32xf32>,
    %cst_28 = arith.constant dense<0.000000e+00> : vector<2x128xf32>
    %88 = tpu.matmul %86, %9, %cst_28 {dimension_numbers = #tpu.dot_dimension_numbers<[1], [0], [0], [1], [0, 0, 1, 1], [], []>} : vector<2x32xf32>, vector<32x128xf32>, vector<2x128xf32> -> vector<2x128xf32>
    %89 = arith.addf %18, %88 : vector<2x128xf32>
    %cst_29 = arith.constant 5.000000e-01 : f32
    %90 = vector.broadcast %cst_29 : f32 to vector<2x128xf32>
    %91 = arith.mulf %90, %89 : vector<2x128xf32>
    %92 = arith.select %7, %89, %91 : vector<2x128xi1>, vector<2x128xf32>
    %93 = math.tanh %92 : vector<2x128xf32>
    %cst_30 = arith.constant 5.000000e-01 : f32
    %94 = vector.broadcast %cst_30 : f32 to vector<2x128xf32>
    %95 = arith.mulf %94, %93 : vector<2x128xf32>
    %cst_31 = arith.constant 5.000000e-01 : f32
    %96 = vector.broadcast %cst_31 : f32 to vector<2x128xf32>
    %97 = arith.addf %95, %96 : vector<2x128xf32>
    %98 = arith.select %7, %93, %97 : vector<2x128xi1>, vector<2x128xf32>
    %99 = vector.extract_strided_slice %98 {offsets = [0, 0], sizes = [2, 32], strides = [1, 1]} : vector<2x128xf32> to vector<2x32xf32>
    %100 = vector.extract_strided_slice %98 {offsets = [0, 32], sizes = [2, 32], strides = [1, 1]} : vector<2x128xf32> to vector<2x32xf32>
    %101 = vector.extract_strided_slice %98 {offsets = [0, 64], sizes = [2, 32], strides = [1, 1]} : vector<2x128xf32> to vector<2x32xf32>
    %102 = vector.extract_strided_slice %98 {offsets = [0, 96], sizes = [2, 32], strides = [1, 1]} : vector<2x128xf32> to vector<2x32xf32>
    %103 = arith.mulf %100, %84 : vector<2x32xf32>
    %104 = arith.mulf %99, %101 : vector<2x32xf32>
    %105 = arith.addf %103, %104 : vector<2x32xf32>
    %106 = math.tanh %105 : vector<2x32xf32>
    %107 = arith.mulf %102, %106 : vector<2x32xf32>
    %c24 = arith.constant 24 : index
    %c0_32 = arith.constant 0 : index
    %108 = vector.load %arg10[%c24, %c0_32] : memref<64x32xf32, #tpu.memory_space<vmem>>, vector<2x32xf32>
    tpu.vector_store %arg10[%c24, %c0_32], %107 {strides = array<i32>} : memref<64x32xf32, #tpu.memory_space<vmem>>, vector<2x32xf32>,
    %cst_33 = arith.constant dense<0.000000e+00> : vector<2x128xf32>
    %109 = tpu.matmul %107, %9, %cst_33 {dimension_numbers = #tpu.dot_dimension_numbers<[1], [0], [0], [1], [0, 0, 1, 1], [], []>} : vector<2x32xf32>, vector<32x128xf32>, vector<2x128xf32> -> vector<2x128xf32>
    %110 = arith.addf %19, %109 : vector<2x128xf32>
    %cst_34 = arith.constant 5.000000e-01 : f32
    %111 = vector.broadcast %cst_34 : f32 to vector<2x128xf32>
    %112 = arith.mulf %111, %110 : vector<2x128xf32>
    %113 = arith.select %7, %110, %112 : vector<2x128xi1>, vector<2x128xf32>
    %114 = math.tanh %113 : vector<2x128xf32>
    %cst_35 = arith.constant 5.000000e-01 : f32
    %115 = vector.broadcast %cst_35 : f32 to vector<2x128xf32>
    %116 = arith.mulf %115, %114 : vector<2x128xf32>
    %cst_36 = arith.constant 5.000000e-01 : f32
    %117 = vector.broadcast %cst_36 : f32 to vector<2x128xf32>
    %118 = arith.addf %116, %117 : vector<2x128xf32>
    %119 = arith.select %7, %114, %118 : vector<2x128xi1>, vector<2x128xf32>
    %120 = vector.extract_strided_slice %119 {offsets = [0, 0], sizes = [2, 32], strides = [1, 1]} : vector<2x128xf32> to vector<2x32xf32>
    %121 = vector.extract_strided_slice %119 {offsets = [0, 32], sizes = [2, 32], strides = [1, 1]} : vector<2x128xf32> to vector<2x32xf32>
    %122 = vector.extract_strided_slice %119 {offsets = [0, 64], sizes = [2, 32], strides = [1, 1]} : vector<2x128xf32> to vector<2x32xf32>
    %123 = vector.extract_strided_slice %119 {offsets = [0, 96], sizes = [2, 32], strides = [1, 1]} : vector<2x128xf32> to vector<2x32xf32>
    %124 = arith.mulf %121, %105 : vector<2x32xf32>
    %125 = arith.mulf %120, %122 : vector<2x32xf32>
    %126 = arith.addf %124, %125 : vector<2x32xf32>
    %127 = math.tanh %126 : vector<2x32xf32>
    %128 = arith.mulf %123, %127 : vector<2x32xf32>
    %c32 = arith.constant 32 : index
    %c0_37 = arith.constant 0 : index
    %129 = vector.load %arg10[%c32, %c0_37] : memref<64x32xf32, #tpu.memory_space<vmem>>, vector<2x32xf32>
    tpu.vector_store %arg10[%c32, %c0_37], %128 {strides = array<i32>} : memref<64x32xf32, #tpu.memory_space<vmem>>, vector<2x32xf32>,
    %cst_38 = arith.constant dense<0.000000e+00> : vector<2x128xf32>
    %130 = tpu.matmul %128, %9, %cst_38 {dimension_numbers = #tpu.dot_dimension_numbers<[1], [0], [0], [1], [0, 0, 1, 1], [], []>} : vector<2x32xf32>, vector<32x128xf32>, vector<2x128xf32> -> vector<2x128xf32>
    %131 = arith.addf %20, %130 : vector<2x128xf32>
    %cst_39 = arith.constant 5.000000e-01 : f32
    %132 = vector.broadcast %cst_39 : f32 to vector<2x128xf32>
    %133 = arith.mulf %132, %131 : vector<2x128xf32>
    %134 = arith.select %7, %131, %133 : vector<2x128xi1>, vector<2x128xf32>
    %135 = math.tanh %134 : vector<2x128xf32>
    %cst_40 = arith.constant 5.000000e-01 : f32
    %136 = vector.broadcast %cst_40 : f32 to vector<2x128xf32>
    %137 = arith.mulf %136, %135 : vector<2x128xf32>
    %cst_41 = arith.constant 5.000000e-01 : f32
    %138 = vector.broadcast %cst_41 : f32 to vector<2x128xf32>
    %139 = arith.addf %137, %138 : vector<2x128xf32>
    %140 = arith.select %7, %135, %139 : vector<2x128xi1>, vector<2x128xf32>
    %141 = vector.extract_strided_slice %140 {offsets = [0, 0], sizes = [2, 32], strides = [1, 1]} : vector<2x128xf32> to vector<2x32xf32>
    %142 = vector.extract_strided_slice %140 {offsets = [0, 32], sizes = [2, 32], strides = [1, 1]} : vector<2x128xf32> to vector<2x32xf32>
    %143 = vector.extract_strided_slice %140 {offsets = [0, 64], sizes = [2, 32], strides = [1, 1]} : vector<2x128xf32> to vector<2x32xf32>
    %144 = vector.extract_strided_slice %140 {offsets = [0, 96], sizes = [2, 32], strides = [1, 1]} : vector<2x128xf32> to vector<2x32xf32>
    %145 = arith.mulf %142, %126 : vector<2x32xf32>
    %146 = arith.mulf %141, %143 : vector<2x32xf32>
    %147 = arith.addf %145, %146 : vector<2x32xf32>
    %148 = math.tanh %147 : vector<2x32xf32>
    %149 = arith.mulf %144, %148 : vector<2x32xf32>
    %c40 = arith.constant 40 : index
    %c0_42 = arith.constant 0 : index
    %150 = vector.load %arg10[%c40, %c0_42] : memref<64x32xf32, #tpu.memory_space<vmem>>, vector<2x32xf32>
    tpu.vector_store %arg10[%c40, %c0_42], %149 {strides = array<i32>} : memref<64x32xf32, #tpu.memory_space<vmem>>, vector<2x32xf32>,
    %cst_43 = arith.constant dense<0.000000e+00> : vector<2x128xf32>
    %151 = tpu.matmul %149, %9, %cst_43 {dimension_numbers = #tpu.dot_dimension_numbers<[1], [0], [0], [1], [0, 0, 1, 1], [], []>} : vector<2x32xf32>, vector<32x128xf32>, vector<2x128xf32> -> vector<2x128xf32>
    %152 = arith.addf %21, %151 : vector<2x128xf32>
    %cst_44 = arith.constant 5.000000e-01 : f32
    %153 = vector.broadcast %cst_44 : f32 to vector<2x128xf32>
    %154 = arith.mulf %153, %152 : vector<2x128xf32>
    %155 = arith.select %7, %152, %154 : vector<2x128xi1>, vector<2x128xf32>
    %156 = math.tanh %155 : vector<2x128xf32>
    %cst_45 = arith.constant 5.000000e-01 : f32
    %157 = vector.broadcast %cst_45 : f32 to vector<2x128xf32>
    %158 = arith.mulf %157, %156 : vector<2x128xf32>
    %cst_46 = arith.constant 5.000000e-01 : f32
    %159 = vector.broadcast %cst_46 : f32 to vector<2x128xf32>
    %160 = arith.addf %158, %159 : vector<2x128xf32>
    %161 = arith.select %7, %156, %160 : vector<2x128xi1>, vector<2x128xf32>
    %162 = vector.extract_strided_slice %161 {offsets = [0, 0], sizes = [2, 32], strides = [1, 1]} : vector<2x128xf32> to vector<2x32xf32>
    %163 = vector.extract_strided_slice %161 {offsets = [0, 32], sizes = [2, 32], strides = [1, 1]} : vector<2x128xf32> to vector<2x32xf32>
    %164 = vector.extract_strided_slice %161 {offsets = [0, 64], sizes = [2, 32], strides = [1, 1]} : vector<2x128xf32> to vector<2x32xf32>
    %165 = vector.extract_strided_slice %161 {offsets = [0, 96], sizes = [2, 32], strides = [1, 1]} : vector<2x128xf32> to vector<2x32xf32>
    %166 = arith.mulf %163, %147 : vector<2x32xf32>
    %167 = arith.mulf %162, %164 : vector<2x32xf32>
    %168 = arith.addf %166, %167 : vector<2x32xf32>
    %169 = math.tanh %168 : vector<2x32xf32>
    %170 = arith.mulf %165, %169 : vector<2x32xf32>
    %c48 = arith.constant 48 : index
    %c0_47 = arith.constant 0 : index
    %171 = vector.load %arg10[%c48, %c0_47] : memref<64x32xf32, #tpu.memory_space<vmem>>, vector<2x32xf32>
    tpu.vector_store %arg10[%c48, %c0_47], %170 {strides = array<i32>} : memref<64x32xf32, #tpu.memory_space<vmem>>, vector<2x32xf32>,
    %cst_48 = arith.constant dense<0.000000e+00> : vector<2x128xf32>
    %172 = tpu.matmul %170, %9, %cst_48 {dimension_numbers = #tpu.dot_dimension_numbers<[1], [0], [0], [1], [0, 0, 1, 1], [], []>} : vector<2x32xf32>, vector<32x128xf32>, vector<2x128xf32> -> vector<2x128xf32>
    %173 = arith.addf %22, %172 : vector<2x128xf32>
    %cst_49 = arith.constant 5.000000e-01 : f32
    %174 = vector.broadcast %cst_49 : f32 to vector<2x128xf32>
    %175 = arith.mulf %174, %173 : vector<2x128xf32>
    %176 = arith.select %7, %173, %175 : vector<2x128xi1>, vector<2x128xf32>
    %177 = math.tanh %176 : vector<2x128xf32>
    %cst_50 = arith.constant 5.000000e-01 : f32
    %178 = vector.broadcast %cst_50 : f32 to vector<2x128xf32>
    %179 = arith.mulf %178, %177 : vector<2x128xf32>
    %cst_51 = arith.constant 5.000000e-01 : f32
    %180 = vector.broadcast %cst_51 : f32 to vector<2x128xf32>
    %181 = arith.addf %179, %180 : vector<2x128xf32>
    %182 = arith.select %7, %177, %181 : vector<2x128xi1>, vector<2x128xf32>
    %183 = vector.extract_strided_slice %182 {offsets = [0, 0], sizes = [2, 32], strides = [1, 1]} : vector<2x128xf32> to vector<2x32xf32>
    %184 = vector.extract_strided_slice %182 {offsets = [0, 32], sizes = [2, 32], strides = [1, 1]} : vector<2x128xf32> to vector<2x32xf32>
    %185 = vector.extract_strided_slice %182 {offsets = [0, 64], sizes = [2, 32], strides = [1, 1]} : vector<2x128xf32> to vector<2x32xf32>
    %186 = vector.extract_strided_slice %182 {offsets = [0, 96], sizes = [2, 32], strides = [1, 1]} : vector<2x128xf32> to vector<2x32xf32>
    %187 = arith.mulf %184, %168 : vector<2x32xf32>
    %188 = arith.mulf %183, %185 : vector<2x32xf32>
    %189 = arith.addf %187, %188 : vector<2x32xf32>
    %190 = math.tanh %189 : vector<2x32xf32>
    %191 = arith.mulf %186, %190 : vector<2x32xf32>
    %c56 = arith.constant 56 : index
    %c0_52 = arith.constant 0 : index
    %192 = vector.load %arg10[%c56, %c0_52] : memref<64x32xf32, #tpu.memory_space<vmem>>, vector<2x32xf32>
    tpu.vector_store %arg10[%c56, %c0_52], %191 {strides = array<i32>} : memref<64x32xf32, #tpu.memory_space<vmem>>, vector<2x32xf32>,
    %c0_53 = arith.constant 0 : index
    %c0_54 = arith.constant 0 : index
    %193 = vector.load %arg4[%c0_53, %c0_54] : memref<32x128xf32, #tpu.memory_space<vmem>>, vector<32x128xf32>
    %c0_55 = arith.constant 0 : index
    %c0_56 = arith.constant 0 : index
    %194 = vector.load %arg5[%c0_55, %c0_56] : memref<32x128xf32, #tpu.memory_space<vmem>>, vector<32x128xf32>
    %c0_57 = arith.constant 0 : index
    %c0_58 = arith.constant 0 : index
    %195 = vector.load %arg6[%c0_57, %c0_58] : memref<1x128xf32, #tpu.memory_space<vmem>>, vector<1x128xf32>
    %c0_59 = arith.constant 0 : index
    %c0_60 = arith.constant 0 : index
    %196 = vector.load %arg10[%c0_59, %c0_60] : memref<64x32xf32, #tpu.memory_space<vmem>>, vector<64x32xf32>
    %cst_61 = arith.constant dense<0.000000e+00> : vector<64x128xf32>
    %197 = tpu.matmul %196, %193, %cst_61 {dimension_numbers = #tpu.dot_dimension_numbers<[1], [0], [0], [1], [0, 0, 1, 1], [], []>} : vector<64x32xf32>, vector<32x128xf32>, vector<64x128xf32> -> vector<64x128xf32>
    %198 = vector.broadcast %195 : vector<1x128xf32> to vector<64x128xf32>
    %199 = arith.addf %197, %198 : vector<64x128xf32>
    %200 = vector.extract_strided_slice %199 {offsets = [0, 0], sizes = [2, 128], strides = [1, 1]} : vector<64x128xf32> to vector<2x128xf32>
    %201 = vector.extract_strided_slice %199 {offsets = [8, 0], sizes = [2, 128], strides = [1, 1]} : vector<64x128xf32> to vector<2x128xf32>
    %202 = vector.extract_strided_slice %199 {offsets = [16, 0], sizes = [2, 128], strides = [1, 1]} : vector<64x128xf32> to vector<2x128xf32>
    %203 = vector.extract_strided_slice %199 {offsets = [24, 0], sizes = [2, 128], strides = [1, 1]} : vector<64x128xf32> to vector<2x128xf32>
    %204 = vector.extract_strided_slice %199 {offsets = [32, 0], sizes = [2, 128], strides = [1, 1]} : vector<64x128xf32> to vector<2x128xf32>
    %205 = vector.extract_strided_slice %199 {offsets = [40, 0], sizes = [2, 128], strides = [1, 1]} : vector<64x128xf32> to vector<2x128xf32>
    %206 = vector.extract_strided_slice %199 {offsets = [48, 0], sizes = [2, 128], strides = [1, 1]} : vector<64x128xf32> to vector<2x128xf32>
    %207 = vector.extract_strided_slice %199 {offsets = [56, 0], sizes = [2, 128], strides = [1, 1]} : vector<64x128xf32> to vector<2x128xf32>
    %cst_62 = arith.constant 0.000000e+00 : f32
    %208 = vector.broadcast %cst_62 : f32 to vector<2x32xf32>
    %cst_63 = arith.constant 0.000000e+00 : f32
    %209 = vector.broadcast %cst_63 : f32 to vector<2x32xf32>
    %cst_64 = arith.constant dense<0.000000e+00> : vector<2x128xf32>
    %210 = tpu.matmul %208, %194, %cst_64 {dimension_numbers = #tpu.dot_dimension_numbers<[1], [0], [0], [1], [0, 0, 1, 1], [], []>} : vector<2x32xf32>, vector<32x128xf32>, vector<2x128xf32> -> vector<2x128xf32>
    %211 = arith.addf %200, %210 : vector<2x128xf32>
    %cst_65 = arith.constant 5.000000e-01 : f32
    %212 = vector.broadcast %cst_65 : f32 to vector<2x128xf32>
    %213 = arith.mulf %212, %211 : vector<2x128xf32>
    %214 = arith.select %7, %211, %213 : vector<2x128xi1>, vector<2x128xf32>
    %215 = math.tanh %214 : vector<2x128xf32>
    %cst_66 = arith.constant 5.000000e-01 : f32
    %216 = vector.broadcast %cst_66 : f32 to vector<2x128xf32>
    %217 = arith.mulf %216, %215 : vector<2x128xf32>
    %cst_67 = arith.constant 5.000000e-01 : f32
    %218 = vector.broadcast %cst_67 : f32 to vector<2x128xf32>
    %219 = arith.addf %217, %218 : vector<2x128xf32>
    %220 = arith.select %7, %215, %219 : vector<2x128xi1>, vector<2x128xf32>
    %221 = vector.extract_strided_slice %220 {offsets = [0, 0], sizes = [2, 32], strides = [1, 1]} : vector<2x128xf32> to vector<2x32xf32>
    %222 = vector.extract_strided_slice %220 {offsets = [0, 32], sizes = [2, 32], strides = [1, 1]} : vector<2x128xf32> to vector<2x32xf32>
    %223 = vector.extract_strided_slice %220 {offsets = [0, 64], sizes = [2, 32], strides = [1, 1]} : vector<2x128xf32> to vector<2x32xf32>
    %224 = vector.extract_strided_slice %220 {offsets = [0, 96], sizes = [2, 32], strides = [1, 1]} : vector<2x128xf32> to vector<2x32xf32>
    %225 = arith.mulf %222, %209 : vector<2x32xf32>
    %226 = arith.mulf %221, %223 : vector<2x32xf32>
    %227 = arith.addf %225, %226 : vector<2x32xf32>
    %228 = math.tanh %227 : vector<2x32xf32>
    %229 = arith.mulf %224, %228 : vector<2x32xf32>
    %cst_68 = arith.constant dense<0.000000e+00> : vector<2x128xf32>
    %230 = tpu.matmul %229, %194, %cst_68 {dimension_numbers = #tpu.dot_dimension_numbers<[1], [0], [0], [1], [0, 0, 1, 1], [], []>} : vector<2x32xf32>, vector<32x128xf32>, vector<2x128xf32> -> vector<2x128xf32>
    %231 = arith.addf %201, %230 : vector<2x128xf32>
    %cst_69 = arith.constant 5.000000e-01 : f32
    %232 = vector.broadcast %cst_69 : f32 to vector<2x128xf32>
    %233 = arith.mulf %232, %231 : vector<2x128xf32>
    %234 = arith.select %7, %231, %233 : vector<2x128xi1>, vector<2x128xf32>
    %235 = math.tanh %234 : vector<2x128xf32>
    %cst_70 = arith.constant 5.000000e-01 : f32
    %236 = vector.broadcast %cst_70 : f32 to vector<2x128xf32>
    %237 = arith.mulf %236, %235 : vector<2x128xf32>
    %cst_71 = arith.constant 5.000000e-01 : f32
    %238 = vector.broadcast %cst_71 : f32 to vector<2x128xf32>
    %239 = arith.addf %237, %238 : vector<2x128xf32>
    %240 = arith.select %7, %235, %239 : vector<2x128xi1>, vector<2x128xf32>
    %241 = vector.extract_strided_slice %240 {offsets = [0, 0], sizes = [2, 32], strides = [1, 1]} : vector<2x128xf32> to vector<2x32xf32>
    %242 = vector.extract_strided_slice %240 {offsets = [0, 32], sizes = [2, 32], strides = [1, 1]} : vector<2x128xf32> to vector<2x32xf32>
    %243 = vector.extract_strided_slice %240 {offsets = [0, 64], sizes = [2, 32], strides = [1, 1]} : vector<2x128xf32> to vector<2x32xf32>
    %244 = vector.extract_strided_slice %240 {offsets = [0, 96], sizes = [2, 32], strides = [1, 1]} : vector<2x128xf32> to vector<2x32xf32>
    %245 = arith.mulf %242, %227 : vector<2x32xf32>
    %246 = arith.mulf %241, %243 : vector<2x32xf32>
    %247 = arith.addf %245, %246 : vector<2x32xf32>
    %248 = math.tanh %247 : vector<2x32xf32>
    %249 = arith.mulf %244, %248 : vector<2x32xf32>
    %cst_72 = arith.constant dense<0.000000e+00> : vector<2x128xf32>
    %250 = tpu.matmul %249, %194, %cst_72 {dimension_numbers = #tpu.dot_dimension_numbers<[1], [0], [0], [1], [0, 0, 1, 1], [], []>} : vector<2x32xf32>, vector<32x128xf32>, vector<2x128xf32> -> vector<2x128xf32>
    %251 = arith.addf %202, %250 : vector<2x128xf32>
    %cst_73 = arith.constant 5.000000e-01 : f32
    %252 = vector.broadcast %cst_73 : f32 to vector<2x128xf32>
    %253 = arith.mulf %252, %251 : vector<2x128xf32>
    %254 = arith.select %7, %251, %253 : vector<2x128xi1>, vector<2x128xf32>
    %255 = math.tanh %254 : vector<2x128xf32>
    %cst_74 = arith.constant 5.000000e-01 : f32
    %256 = vector.broadcast %cst_74 : f32 to vector<2x128xf32>
    %257 = arith.mulf %256, %255 : vector<2x128xf32>
    %cst_75 = arith.constant 5.000000e-01 : f32
    %258 = vector.broadcast %cst_75 : f32 to vector<2x128xf32>
    %259 = arith.addf %257, %258 : vector<2x128xf32>
    %260 = arith.select %7, %255, %259 : vector<2x128xi1>, vector<2x128xf32>
    %261 = vector.extract_strided_slice %260 {offsets = [0, 0], sizes = [2, 32], strides = [1, 1]} : vector<2x128xf32> to vector<2x32xf32>
    %262 = vector.extract_strided_slice %260 {offsets = [0, 32], sizes = [2, 32], strides = [1, 1]} : vector<2x128xf32> to vector<2x32xf32>
    %263 = vector.extract_strided_slice %260 {offsets = [0, 64], sizes = [2, 32], strides = [1, 1]} : vector<2x128xf32> to vector<2x32xf32>
    %264 = vector.extract_strided_slice %260 {offsets = [0, 96], sizes = [2, 32], strides = [1, 1]} : vector<2x128xf32> to vector<2x32xf32>
    %265 = arith.mulf %262, %247 : vector<2x32xf32>
    %266 = arith.mulf %261, %263 : vector<2x32xf32>
    %267 = arith.addf %265, %266 : vector<2x32xf32>
    %268 = math.tanh %267 : vector<2x32xf32>
    %269 = arith.mulf %264, %268 : vector<2x32xf32>
    %cst_76 = arith.constant dense<0.000000e+00> : vector<2x128xf32>
    %270 = tpu.matmul %269, %194, %cst_76 {dimension_numbers = #tpu.dot_dimension_numbers<[1], [0], [0], [1], [0, 0, 1, 1], [], []>} : vector<2x32xf32>, vector<32x128xf32>, vector<2x128xf32> -> vector<2x128xf32>
    %271 = arith.addf %203, %270 : vector<2x128xf32>
    %cst_77 = arith.constant 5.000000e-01 : f32
    %272 = vector.broadcast %cst_77 : f32 to vector<2x128xf32>
    %273 = arith.mulf %272, %271 : vector<2x128xf32>
    %274 = arith.select %7, %271, %273 : vector<2x128xi1>, vector<2x128xf32>
    %275 = math.tanh %274 : vector<2x128xf32>
    %cst_78 = arith.constant 5.000000e-01 : f32
    %276 = vector.broadcast %cst_78 : f32 to vector<2x128xf32>
    %277 = arith.mulf %276, %275 : vector<2x128xf32>
    %cst_79 = arith.constant 5.000000e-01 : f32
    %278 = vector.broadcast %cst_79 : f32 to vector<2x128xf32>
    %279 = arith.addf %277, %278 : vector<2x128xf32>
    %280 = arith.select %7, %275, %279 : vector<2x128xi1>, vector<2x128xf32>
    %281 = vector.extract_strided_slice %280 {offsets = [0, 0], sizes = [2, 32], strides = [1, 1]} : vector<2x128xf32> to vector<2x32xf32>
    %282 = vector.extract_strided_slice %280 {offsets = [0, 32], sizes = [2, 32], strides = [1, 1]} : vector<2x128xf32> to vector<2x32xf32>
    %283 = vector.extract_strided_slice %280 {offsets = [0, 64], sizes = [2, 32], strides = [1, 1]} : vector<2x128xf32> to vector<2x32xf32>
    %284 = vector.extract_strided_slice %280 {offsets = [0, 96], sizes = [2, 32], strides = [1, 1]} : vector<2x128xf32> to vector<2x32xf32>
    %285 = arith.mulf %282, %267 : vector<2x32xf32>
    %286 = arith.mulf %281, %283 : vector<2x32xf32>
    %287 = arith.addf %285, %286 : vector<2x32xf32>
    %288 = math.tanh %287 : vector<2x32xf32>
    %289 = arith.mulf %284, %288 : vector<2x32xf32>
    %cst_80 = arith.constant dense<0.000000e+00> : vector<2x128xf32>
    %290 = tpu.matmul %289, %194, %cst_80 {dimension_numbers = #tpu.dot_dimension_numbers<[1], [0], [0], [1], [0, 0, 1, 1], [], []>} : vector<2x32xf32>, vector<32x128xf32>, vector<2x128xf32> -> vector<2x128xf32>
    %291 = arith.addf %204, %290 : vector<2x128xf32>
    %cst_81 = arith.constant 5.000000e-01 : f32
    %292 = vector.broadcast %cst_81 : f32 to vector<2x128xf32>
    %293 = arith.mulf %292, %291 : vector<2x128xf32>
    %294 = arith.select %7, %291, %293 : vector<2x128xi1>, vector<2x128xf32>
    %295 = math.tanh %294 : vector<2x128xf32>
    %cst_82 = arith.constant 5.000000e-01 : f32
    %296 = vector.broadcast %cst_82 : f32 to vector<2x128xf32>
    %297 = arith.mulf %296, %295 : vector<2x128xf32>
    %cst_83 = arith.constant 5.000000e-01 : f32
    %298 = vector.broadcast %cst_83 : f32 to vector<2x128xf32>
    %299 = arith.addf %297, %298 : vector<2x128xf32>
    %300 = arith.select %7, %295, %299 : vector<2x128xi1>, vector<2x128xf32>
    %301 = vector.extract_strided_slice %300 {offsets = [0, 0], sizes = [2, 32], strides = [1, 1]} : vector<2x128xf32> to vector<2x32xf32>
    %302 = vector.extract_strided_slice %300 {offsets = [0, 32], sizes = [2, 32], strides = [1, 1]} : vector<2x128xf32> to vector<2x32xf32>
    %303 = vector.extract_strided_slice %300 {offsets = [0, 64], sizes = [2, 32], strides = [1, 1]} : vector<2x128xf32> to vector<2x32xf32>
    %304 = vector.extract_strided_slice %300 {offsets = [0, 96], sizes = [2, 32], strides = [1, 1]} : vector<2x128xf32> to vector<2x32xf32>
    %305 = arith.mulf %302, %287 : vector<2x32xf32>
    %306 = arith.mulf %301, %303 : vector<2x32xf32>
    %307 = arith.addf %305, %306 : vector<2x32xf32>
    %308 = math.tanh %307 : vector<2x32xf32>
    %309 = arith.mulf %304, %308 : vector<2x32xf32>
    %cst_84 = arith.constant dense<0.000000e+00> : vector<2x128xf32>
    %310 = tpu.matmul %309, %194, %cst_84 {dimension_numbers = #tpu.dot_dimension_numbers<[1], [0], [0], [1], [0, 0, 1, 1], [], []>} : vector<2x32xf32>, vector<32x128xf32>, vector<2x128xf32> -> vector<2x128xf32>
    %311 = arith.addf %205, %310 : vector<2x128xf32>
    %cst_85 = arith.constant 5.000000e-01 : f32
    %312 = vector.broadcast %cst_85 : f32 to vector<2x128xf32>
    %313 = arith.mulf %312, %311 : vector<2x128xf32>
    %314 = arith.select %7, %311, %313 : vector<2x128xi1>, vector<2x128xf32>
    %315 = math.tanh %314 : vector<2x128xf32>
    %cst_86 = arith.constant 5.000000e-01 : f32
    %316 = vector.broadcast %cst_86 : f32 to vector<2x128xf32>
    %317 = arith.mulf %316, %315 : vector<2x128xf32>
    %cst_87 = arith.constant 5.000000e-01 : f32
    %318 = vector.broadcast %cst_87 : f32 to vector<2x128xf32>
    %319 = arith.addf %317, %318 : vector<2x128xf32>
    %320 = arith.select %7, %315, %319 : vector<2x128xi1>, vector<2x128xf32>
    %321 = vector.extract_strided_slice %320 {offsets = [0, 0], sizes = [2, 32], strides = [1, 1]} : vector<2x128xf32> to vector<2x32xf32>
    %322 = vector.extract_strided_slice %320 {offsets = [0, 32], sizes = [2, 32], strides = [1, 1]} : vector<2x128xf32> to vector<2x32xf32>
    %323 = vector.extract_strided_slice %320 {offsets = [0, 64], sizes = [2, 32], strides = [1, 1]} : vector<2x128xf32> to vector<2x32xf32>
    %324 = vector.extract_strided_slice %320 {offsets = [0, 96], sizes = [2, 32], strides = [1, 1]} : vector<2x128xf32> to vector<2x32xf32>
    %325 = arith.mulf %322, %307 : vector<2x32xf32>
    %326 = arith.mulf %321, %323 : vector<2x32xf32>
    %327 = arith.addf %325, %326 : vector<2x32xf32>
    %328 = math.tanh %327 : vector<2x32xf32>
    %329 = arith.mulf %324, %328 : vector<2x32xf32>
    %cst_88 = arith.constant dense<0.000000e+00> : vector<2x128xf32>
    %330 = tpu.matmul %329, %194, %cst_88 {dimension_numbers = #tpu.dot_dimension_numbers<[1], [0], [0], [1], [0, 0, 1, 1], [], []>} : vector<2x32xf32>, vector<32x128xf32>, vector<2x128xf32> -> vector<2x128xf32>
    %331 = arith.addf %206, %330 : vector<2x128xf32>
    %cst_89 = arith.constant 5.000000e-01 : f32
    %332 = vector.broadcast %cst_89 : f32 to vector<2x128xf32>
    %333 = arith.mulf %332, %331 : vector<2x128xf32>
    %334 = arith.select %7, %331, %333 : vector<2x128xi1>, vector<2x128xf32>
    %335 = math.tanh %334 : vector<2x128xf32>
    %cst_90 = arith.constant 5.000000e-01 : f32
    %336 = vector.broadcast %cst_90 : f32 to vector<2x128xf32>
    %337 = arith.mulf %336, %335 : vector<2x128xf32>
    %cst_91 = arith.constant 5.000000e-01 : f32
    %338 = vector.broadcast %cst_91 : f32 to vector<2x128xf32>
    %339 = arith.addf %337, %338 : vector<2x128xf32>
    %340 = arith.select %7, %335, %339 : vector<2x128xi1>, vector<2x128xf32>
    %341 = vector.extract_strided_slice %340 {offsets = [0, 0], sizes = [2, 32], strides = [1, 1]} : vector<2x128xf32> to vector<2x32xf32>
    %342 = vector.extract_strided_slice %340 {offsets = [0, 32], sizes = [2, 32], strides = [1, 1]} : vector<2x128xf32> to vector<2x32xf32>
    %343 = vector.extract_strided_slice %340 {offsets = [0, 64], sizes = [2, 32], strides = [1, 1]} : vector<2x128xf32> to vector<2x32xf32>
    %344 = vector.extract_strided_slice %340 {offsets = [0, 96], sizes = [2, 32], strides = [1, 1]} : vector<2x128xf32> to vector<2x32xf32>
    %345 = arith.mulf %342, %327 : vector<2x32xf32>
    %346 = arith.mulf %341, %343 : vector<2x32xf32>
    %347 = arith.addf %345, %346 : vector<2x32xf32>
    %348 = math.tanh %347 : vector<2x32xf32>
    %349 = arith.mulf %344, %348 : vector<2x32xf32>
    %cst_92 = arith.constant dense<0.000000e+00> : vector<2x128xf32>
    %350 = tpu.matmul %349, %194, %cst_92 {dimension_numbers = #tpu.dot_dimension_numbers<[1], [0], [0], [1], [0, 0, 1, 1], [], []>} : vector<2x32xf32>, vector<32x128xf32>, vector<2x128xf32> -> vector<2x128xf32>
    %351 = arith.addf %207, %350 : vector<2x128xf32>
    %cst_93 = arith.constant 5.000000e-01 : f32
    %352 = vector.broadcast %cst_93 : f32 to vector<2x128xf32>
    %353 = arith.mulf %352, %351 : vector<2x128xf32>
    %354 = arith.select %7, %351, %353 : vector<2x128xi1>, vector<2x128xf32>
    %355 = math.tanh %354 : vector<2x128xf32>
    %cst_94 = arith.constant 5.000000e-01 : f32
    %356 = vector.broadcast %cst_94 : f32 to vector<2x128xf32>
    %357 = arith.mulf %356, %355 : vector<2x128xf32>
    %cst_95 = arith.constant 5.000000e-01 : f32
    %358 = vector.broadcast %cst_95 : f32 to vector<2x128xf32>
    %359 = arith.addf %357, %358 : vector<2x128xf32>
    %360 = arith.select %7, %355, %359 : vector<2x128xi1>, vector<2x128xf32>
    %361 = vector.extract_strided_slice %360 {offsets = [0, 0], sizes = [2, 32], strides = [1, 1]} : vector<2x128xf32> to vector<2x32xf32>
    %362 = vector.extract_strided_slice %360 {offsets = [0, 32], sizes = [2, 32], strides = [1, 1]} : vector<2x128xf32> to vector<2x32xf32>
    %363 = vector.extract_strided_slice %360 {offsets = [0, 64], sizes = [2, 32], strides = [1, 1]} : vector<2x128xf32> to vector<2x32xf32>
    %364 = vector.extract_strided_slice %360 {offsets = [0, 96], sizes = [2, 32], strides = [1, 1]} : vector<2x128xf32> to vector<2x32xf32>
    %365 = arith.mulf %362, %347 : vector<2x32xf32>
    %366 = arith.mulf %361, %363 : vector<2x32xf32>
    %367 = arith.addf %365, %366 : vector<2x32xf32>
    %368 = math.tanh %367 : vector<2x32xf32>
    %369 = arith.mulf %364, %368 : vector<2x32xf32>
    %c0_96 = arith.constant 0 : index
    %c0_97 = arith.constant 0 : index
    %370 = vector.load %arg7[%c0_96, %c0_97] : memref<1x32xf32, #tpu.memory_space<vmem>>, vector<1x32xf32>
    %371 = vector.broadcast %370 : vector<1x32xf32> to vector<2x32xf32>
    %372 = arith.mulf %369, %371 : vector<2x32xf32>
    %cst_98 = arith.constant dense<0.000000e+00> : vector<2xf32>
    %373 = vector.multi_reduction <add>, %372, %cst_98 [1] : vector<2x32xf32> to vector<2xf32>
    %374 = vector.shape_cast %373 : vector<2xf32> to vector<2x1xf32>
    %c0_99 = arith.constant 0 : index
    %c0_100 = arith.constant 0 : index
    %375 = vector.load %arg8[%c0_99, %c0_100] : memref<1x1xf32, #tpu.memory_space<vmem>>, vector<1x1xf32>
    %376 = vector.broadcast %375 : vector<1x1xf32> to vector<2x1xf32>
    %377 = arith.addf %374, %376 : vector<2x1xf32>
    %c0_101 = arith.constant 0 : index
    %c0_102 = arith.constant 0 : index
    %378 = vector.load %arg9[%c0_101, %c0_102] : memref<2x1xf32, #tpu.memory_space<vmem>>, vector<2x1xf32>
    tpu.vector_store %arg9[%c0_101, %c0_102], %377 {strides = array<i32>} : memref<2x1xf32, #tpu.memory_space<vmem>>, vector<2x1xf32>,
    return
  }
}

</mosaic_0001>

<bundles_post_ra>
// kernel: tpu_custom_call.1
= control target key start
LH: loop header
LB: loop body
LE: loop exit
PB: predicated region body
PF: predicated region fallthrough
CT: control target
= control target key end

     0   :  { %s1612_s0 = inlined_call_operand.vmem [shape: f32[64,8], index: 0, kind: input, shape index: {}]   ;;  %s1613_s1 = inlined_call_operand.vmem [shape: f32[8,128], index: 1, kind: input, shape index: {}]   ;;  %s1614_s2 = inlined_call_operand.vmem [shape: f32[32,128], index: 2, kind: input, shape index: {}]   ;;  %s1615_s3 = inlined_call_operand.vmem [shape: f32[1,128], index: 3, kind: input, shape index: {}]   ;;  %s1616_s4 = inlined_call_operand.vmem [shape: f32[32,128], index: 4, kind: input, shape index: {}]   ;;  %s1617_s5 = inlined_call_operand.hbm [shape: f32[32,128], index: 5, kind: input, shape index: {}]   ;;  %s1618_s6 = inlined_call_operand.vmem [shape: f32[1,128], index: 6, kind: input, shape index: {}]   ;;  %s1619_s7 = inlined_call_operand.vmem [shape: f32[1,32], index: 7, kind: input, shape index: {}]   ;;  %s1620_s8 = inlined_call_operand.<no memory space> [shape: f32[1,1], index: 8, kind: input, shape index: {}]   ;;  %s1621_s9 = inlined_call_operand.vmem [shape: f32[2,1], index: 9, kind: output, shape index: {}]  }
   0x1   :  { %v14_v0 = vstv %s1620_s8 }
   0x2   :  { %15 = vst [vmem:[#allocation3] sm:$0x1] %v14_v0 }
   0x3   :  { %16 = vsyncpa [#allocation5], 0  ;;  %s31_s13 = sshll.u32 %s1617_s5, 4  ;;  %s1186_s14 = smov [#allocation4]   ;;  %s32_s13 = int_to_ptr.hbm [resolvable:$true] %s31_s13 }
   0x4   :  { %s33_s15 = sshll.u32 %s1186_s14, 4  ;;  %s1187_s16 = smov 128   ;;  %s34_s15 = int_to_ptr.vmem [resolvable:$true] %s33_s15 }
   0x5   :  { %s1188_s17 = smov 8  }
   0x6   :  { %39 = dma.hbm_to_vmem [thread:$0]  %s32_s13, 512, %s34_s15, [#allocation5], %s1187_s16, %s1187_s16, %s1188_s17  }
   0x7   :  { %1184 = dma.done.wait [#allocation5], 512  }
   0x8   :  { %1185 = vsyncadd [#allocation5], 4294966784  ;;  %vm81_vm0 = vcmask 64512   ;;  %v1252_v1 = vld [vmem:[%s1614_s2 + $0x18] sm:$0xff]  ;;  %v1257_v2 = vld [vmem:[%s1614_s2 + $0x10] sm:$0xff]  ;;  %v1189_v7 = vmov 0.0   ;;  %v59_v8 = vlaneseq }
   0x9   :  { %v64_v3 = vld [vmem:[%s1613_s1] sm:$0xff]  ;;  %162 = vmatpush.msra.mxu1 %v1252_v1  ;;  %v1269_v5 = vld [vmem:[%s1614_s2 + $0x8] sm:$0xff]  ;;  %214 = vmatpush.msra.mxu2 %v1252_v1  ;;  %s1191_s28 = smov 32   ;;  %vm50_vm4 = vcmask 261120   ;;  %v560_v30 = vld [vmem:[%s1616_s4 + $0x18] sm:$0xff]  ;;  %vm198_vm5 = vcmask 254976  }
   0xa   :  { %121 = vmatpush.msra.mxu0 %v64_v3  ;;  %v70_v4 = vld [vmem:[%s1612_s0] sm:$0xff]  ;;  %v60_v11 = vand.u32 127, %v59_v8  ;;  %51 = vst.msk [vmem:[#allocation2] sm:$0xff] %vm50_vm4, %v1189_v7  ;;  %v559_v31 = vld [vmem:[%s1616_s4 + $0x10] sm:$0xff]  ;;  %v71_v32 = vld [vmem:[%s1612_s0 + $0x8] sm:$0xff]  ;;  %613 = vmatpush.msra.mxu3 %v560_v30  ;;  %s1192_s27 = smov 96  }
   0xb   :  { %1055 = vmatmul.msk.f32.vlgmr.msra.gmra.mxu0 %vm81_vm0, %v70_v4  ;;  %163 = vmatpush.msra.mxu1 %v1257_v2  ;;  %v1277_v6 = vld [vmem:[%s1614_s2] sm:$0xff]  ;;  %52 = vst.msk [vmem:[#allocation2 + $0x8] sm:$0xff] %vm50_vm4, %v1189_v7  ;;  %v558_v33 = vld [vmem:[%s1616_s4 + $0x8] sm:$0xff]  ;;  %v72_v53 = vld [vmem:[%s1612_s0 + $0x10] sm:$0xff]  ;;  %vm1048_vm6 = vcmask 1024  }
   0xc   :  { %215 = vmatpush.msra.mxu2 %v1257_v2  ;;  %v1300_v9 = vld [vmem:[%s1615_s3] ss:$0 sm:$0xff]  ;;  %vm61_vm1 = vcmp.ge.s32.totalorder %v60_v11, 64  ;;  %vm62_vm2 = vcmp.lt.s32.totalorder %v60_v11, 96  ;;  %s1190_s3 = smov 64   ;;  %53 = vst.msk [vmem:[#allocation2 + $0x10] sm:$0xff] %vm50_vm4, %v1189_v7  ;;  %614 = vmatpush.msra.mxu3 %v559_v31 }
   0xd   :  { %164 = vmatpush.msra.mxu1 %v1269_v5  ;;  %vm1303_vm3 = vmand %vm61_vm1, %vm62_vm2  ;;  %54 = vst.msk [vmem:[#allocation2 + $0x18] sm:$0xff] %vm50_vm4, %v1189_v7  ;;  %v557_v34 = vld [vmem:[%s1616_s4] sm:$0xff] }
   0xe   :  { %216 = vmatpush.msra.mxu2 %v1269_v5  ;;  %55 = vst.msk [vmem:[#allocation2 + $0x20] sm:$0xff] %vm50_vm4, %v1189_v7  ;;  %615 = vmatpush.msra.mxu3 %v558_v33 }
   0xf   :  { %165 = vmatpush.msra.mxu1 %v1277_v6  ;;  %56 = vst.msk [vmem:[#allocation2 + $0x28] sm:$0xff] %vm50_vm4, %v1189_v7 }
  0x10   :  { %166 = vmatmul.f32.vlgmr.msra.gmra.mxu1 %v1189_v7  ;;  %217 = vmatpush.msra.mxu2 %v1277_v6  ;;  %57 = vst.msk [vmem:[#allocation2 + $0x30] sm:$0xff] %vm50_vm4, %v1189_v7 }
  0x11   :  { %265 = vmatpush.msrb.mxu1 %v1252_v1  ;;  %58 = vst.msk [vmem:[#allocation2 + $0x38] sm:$0xff] %vm50_vm4, %v1189_v7  ;;  %616 = vmatpush.msra.mxu3 %v557_v34 }
  0x12   :  { %367 = vmatpush.msrb.mxu2 %v1252_v1 }
  0x13   :  { %266 = vmatpush.msrb.mxu1 %v1257_v2  ;;  %1056 = vmatmul.msk.f32.gmra.mxu0 %vm81_vm0, %v71_v32 }
  0x14   :  { %368 = vmatpush.msrb.mxu2 %v1257_v2 }
  0x15   :  { %267 = vmatpush.msrb.mxu1 %v1269_v5 }
  0x16   :  { %369 = vmatpush.msrb.mxu2 %v1269_v5 }
  0x17   :  { %268 = vmatpush.msrb.mxu1 %v1277_v6 }
  0x18   :  { %370 = vmatpush.msrb.mxu2 %v1277_v6 }
  0x19   :  { %316 = vmatpush.msra.mxu1 %v1252_v1 }
  0x1b   :  { %317 = vmatpush.msra.mxu1 %v1257_v2  ;;  %1057 = vmatmul.msk.f32.gmra.mxu0 %vm81_vm0, %v72_v53 }
  0x1d   :  { %318 = vmatpush.msra.mxu1 %v1269_v5 }
  0x1f   :  { %319 = vmatpush.msra.mxu1 %v1277_v6 }
  0x88   :  { %v123_v10 = vpop.f32.mrf.mxu0 }
  0x89   :  { %v124_v12 = vadd.f32 %v1300_v9, %v123_v10 }
  0x8d   :  { %v167_v13 = vpop.f32.mrf.mxu1 }
  0x8e   :  { %v170_v14 = vadd.f32 %v167_v13, %v124_v12 }
  0x90   :  { %v171_v16 = vmul.f32 0.5, %v170_v14  ;;  %v126_v37 = vpop.f32.mrf.mxu0 }
  0x91   :  { %v127_v38 = vadd.f32 %v1300_v9, %v126_v37 }
  0x92   :  { %v172_v17 = vsel %vm1303_vm3, %v170_v14, %v171_v16 }
  0x93   :  { %1096 = vtanh.f32 %v172_v17  ;;  %v73_v17 = vld [vmem:[%s1612_s0 + $0x18] sm:$0xff] }
  0x94   :  { %1058 = vmatmul.msk.f32.gmra.mxu0 %vm81_vm0, %v73_v17 }
  0x98   :  { %v129_v58 = vpop.f32.mrf.mxu0 }
  0x99   :  { %v1097_v18 = vpop.eup %1096  ;;  %v130_v59 = vadd.f32 %v1300_v9, %v129_v58 }
  0x9a   :  { %v174_v19 = vmul.f32 0.5, %v1097_v18 }
  0x9c   :  { %v175_v20 = vadd.f32 0.5, %v174_v19 }
  0x9e   :  { %v176_v21 = vsel %vm1303_vm3, %v1097_v18, %v175_v20 }
  0x9f   :  { %179 = vrot.lane.b32.xlu0 %v176_v21, %s1190_s3  ;;  %v177_v24 = vmul.f32 0.0, %v176_v21 }
 0x111   :  { %v180_v22 = vpop.permute.xlu0 %179 }
 0x112   :  { %v182_v23 = vmul.f32 %v180_v22, %v176_v21  ;;  %v132_v22 = vpop.f32.mrf.mxu0 }
 0x114   :  { %184 = vrot.lane.b32.xlu0 %v182_v23, %s1191_s28  ;;  %v133_v23 = vadd.f32 %v1300_v9, %v132_v22  ;;  %v1442_v22 = vld [vmem:[#allocation4 + $0x18] sm:$0xff] }
 0x186   :  { %v185_v25 = vpop.permute.xlu0 %184 }
 0x187   :  { %v187_v26 = vadd.f32 %v185_v25, %v177_v24 }
 0x189   :  { %1098 = vtanh.f32 %v187_v26 }
 0x18f   :  { %v1099_v27 = vpop.eup %1098 }
 0x190   :  { %190 = vrot.lane.b32.xlu1 %v1099_v27, %s1190_s3 }
 0x202   :  { %v191_v28 = vpop.permute.xlu1 %190 }
 0x203   :  { %v193_v29 = vmul.f32 %v191_v28, %v176_v21 }
 0x205   :  { %195 = vrot.lane.b32.xlu1 %v193_v29, %s1191_s28 }
 0x277   :  { %v196_v35 = vpop.permute.xlu1 %195 }
 0x278   :  { %199 = vst.msk [vmem:[#allocation2] sm:$0x3] %vm198_vm5, %v196_v35  ;;  %1063 = vmatmul.msk.f32.vlgmr.msra.gmra.mxu2 %vm50_vm4, %v196_v35 }
 0x279   :  { %418 = vmatpush.msra.mxu2 %v1252_v1 }
 0x27b   :  { %419 = vmatpush.msra.mxu2 %v1257_v2 }
 0x27d   :  { %420 = vmatpush.msra.mxu2 %v1269_v5 }
 0x27f   :  { %v566_v36 = vld [vmem:[#allocation2] sm:$0xff]  ;;  %421 = vmatpush.msra.mxu2 %v1277_v6 }
 0x280   :  { %1070 = vmatmul.msk.f32.vlgmr.msra.gmra.mxu3 %vm50_vm4, %v566_v36 }
 0x2fb   :  { %v219_v39 = vpop.f32.mrf.mxu2 }
 0x2fc   :  { %v222_v40 = vadd.f32 %v219_v39, %v127_v38 }
 0x2fe   :  { %v223_v41 = vmul.f32 0.5, %v222_v40 }
 0x300   :  { %v224_v42 = vsel %vm1303_vm3, %v222_v40, %v223_v41  ;;  %v74_v40 = vld [vmem:[%s1612_s0 + $0x20] sm:$0xff] }
 0x301   :  { %1100 = vtanh.f32 %v224_v42  ;;  %1059 = vmatmul.msk.f32.gmra.mxu0 %vm81_vm0, %v74_v40 }
 0x307   :  { %v1101_v43 = vpop.eup %1100 }
 0x308   :  { %v226_v44 = vmul.f32 0.5, %v1101_v43 }
 0x30a   :  { %v227_v45 = vadd.f32 0.5, %v226_v44 }
 0x30c   :  { %v228_v46 = vsel %vm1303_vm3, %v1101_v43, %v227_v45 }
 0x30d   :  { %231 = vrot.lane.b32.xlu2 %v228_v46, %s1190_s3  ;;  %v229_v49 = vmul.f32 %v228_v46, %v187_v26 }
 0x367   :  { %v232_v47 = vpop.permute.xlu2 %231 }
 0x368   :  { %v234_v48 = vmul.f32 %v232_v47, %v228_v46 }
 0x36a   :  { %236 = vrot.lane.b32.xlu2 %v234_v48, %s1191_s28 }
 0x37e   :  { %v135_v43 = vpop.f32.mrf.mxu0 }
 0x37f   :  { %v136_v44 = vadd.f32 %v1300_v9, %v135_v43 }
 0x3c4   :  { %v237_v50 = vpop.permute.xlu2 %236 }
 0x3c5   :  { %v239_v51 = vadd.f32 %v237_v50, %v229_v49 }
 0x3c7   :  { %1102 = vtanh.f32 %v239_v51 }
 0x3cd   :  { %v1103_v52 = vpop.eup %1102 }
 0x3ce   :  { %242 = vrot.lane.b32.xlu0 %v1103_v52, %s1190_s3 }
 0x440   :  { %v243_v54 = vpop.permute.xlu0 %242 }
 0x441   :  { %v245_v55 = vmul.f32 %v243_v54, %v228_v46 }
 0x443   :  { %247 = vrot.lane.b32.xlu1 %v245_v55, %s1191_s28 }
 0x4b5   :  { %v248_v56 = vpop.permute.xlu1 %247 }
 0x4b6   :  { %250 = vst.msk [vmem:[#allocation2 + $0x8] sm:$0x3] %vm198_vm5, %v248_v56  ;;  %1064 = vmatmul.msk.f32.vlgmr.msrb.gmra.mxu1 %vm50_vm4, %v248_v56 }
 0x4b7   :  { %469 = vmatpush.msrb.mxu1 %v1252_v1 }
 0x4b9   :  { %470 = vmatpush.msrb.mxu1 %v1257_v2 }
 0x4bb   :  { %471 = vmatpush.msrb.mxu1 %v1269_v5 }
 0x4bd   :  { %v567_v57 = vld [vmem:[#allocation2 + $0x8] sm:$0xff]  ;;  %472 = vmatpush.msrb.mxu1 %v1277_v6 }
 0x4be   :  { %1071 = vmatmul.msk.f32.gmra.mxu3 %vm50_vm4, %v567_v57  ;;  %v75_v57 = vld [vmem:[%s1612_s0 + $0x28] sm:$0xff] }
 0x4bf   :  { %1060 = vmatmul.msk.f32.gmra.mxu0 %vm81_vm0, %v75_v57 }
 0x533   :  { %v270_v60 = vpop.f32.mrf.mxu1 }
 0x534   :  { %v273_v61 = vadd.f32 %v270_v60, %v130_v59 }
 0x536   :  { %v274_v62 = vmul.f32 0.5, %v273_v61 }
 0x538   :  { %v275_v63 = vsel %vm1303_vm3, %v273_v61, %v274_v62 }
 0x539   :  { %1104 = vtanh.f32 %v275_v63 }
 0x53c   :  { %v138_v60 = vpop.f32.mrf.mxu0 }
 0x53d   :  { %v139_v61 = vadd.f32 %v1300_v9, %v138_v60  ;;  %v77_v60 = vld [vmem:[%s1612_s0 + $0x38] sm:$0xff] }
 0x53f   :  { %v1105_v0 = vpop.eup %1104 }
 0x540   :  { %v277_v3 = vmul.f32 0.5, %v1105_v0 }
 0x542   :  { %v278_v4 = vadd.f32 0.5, %v277_v3 }
 0x544   :  { %v279_v8 = vsel %vm1303_vm3, %v1105_v0, %v278_v4 }
 0x545   :  { %282 = vrot.lane.b32.xlu2 %v279_v8, %s1190_s3  ;;  %v280_v12 = vmul.f32 %v279_v8, %v239_v51 }
 0x59f   :  { %v283_v10 = vpop.permute.xlu2 %282 }
 0x5a0   :  { %v285_v11 = vmul.f32 %v283_v10, %v279_v8 }
 0x5a2   :  { %287 = vrot.lane.b32.xlu0 %v285_v11, %s1191_s28 }
 0x614   :  { %v288_v13 = vpop.permute.xlu0 %287 }
 0x615   :  { %v290_v14 = vadd.f32 %v288_v13, %v280_v12 }
 0x617   :  { %1106 = vtanh.f32 %v290_v14 }
 0x61d   :  { %v1107_v16 = vpop.eup %1106 }
 0x61e   :  { %293 = vrot.lane.b32.xlu1 %v1107_v16, %s1190_s3 }
 0x690   :  { %v294_v18 = vpop.permute.xlu1 %293 }
 0x691   :  { %v296_v19 = vmul.f32 %v294_v18, %v279_v8 }
 0x693   :  { %298 = vrot.lane.b32.xlu2 %v296_v19, %s1191_s28  ;;  %v76_v19 = vld [vmem:[%s1612_s0 + $0x30] sm:$0xff] }
 0x694   :  { %1061 = vmatmul.msk.f32.gmra.mxu0 %vm81_vm0, %v76_v19 }
 0x69c   :  { %1062 = vmatmul.msk.f32.gmra.mxu0 %vm81_vm0, %v77_v60 }
 0x6ed   :  { %v299_v20 = vpop.permute.xlu2 %298 }
 0x6ee   :  { %301 = vst.msk [vmem:[#allocation2 + $0x10] sm:$0x3] %vm198_vm5, %v299_v20  ;;  %1065 = vmatmul.msk.f32.vlgmr.msra.gmra.mxu1 %vm50_vm4, %v299_v20 }
 0x6ef   :  { %654 = vmatpush.msra.mxu1 %v1442_v22 }
 0x6f5   :  { %v568_v21 = vld [vmem:[#allocation2 + $0x10] sm:$0xff] }
 0x6f6   :  { %1072 = vmatmul.msk.f32.gmra.mxu3 %vm50_vm4, %v568_v21 }
 0x76b   :  { %v321_v24 = vpop.f32.mrf.mxu1 }
 0x76c   :  { %v324_v25 = vadd.f32 %v321_v24, %v133_v23  ;;  %v1444_v23 = vld [vmem:[#allocation4 + $0x10] sm:$0xff]  ;;  %v1448_v24 = vld [vmem:[#allocation4 + $0x8] sm:$0xff] }
 0x76d   :  { %655 = vmatpush.msra.mxu1 %v1444_v23 }
 0x76e   :  { %v325_v26 = vmul.f32 0.5, %v324_v25 }
 0x76f   :  { %656 = vmatpush.msra.mxu1 %v1448_v24 }
 0x770   :  { %v326_v27 = vsel %vm1303_vm3, %v324_v25, %v325_v26  ;;  %v1452_v25 = vld [vmem:[#allocation4] sm:$0xff] }
 0x771   :  { %1108 = vtanh.f32 %v326_v27  ;;  %657 = vmatpush.msra.mxu1 %v1452_v25 }
 0x777   :  { %v1109_v28 = vpop.eup %1108 }
 0x778   :  { %v328_v29 = vmul.f32 0.5, %v1109_v28 }
 0x77a   :  { %v329_v30 = vadd.f32 0.5, %v328_v29 }
 0x77c   :  { %v330_v31 = vsel %vm1303_vm3, %v1109_v28, %v329_v30  ;;  %v141_v28 = vpop.f32.mrf.mxu0 }
 0x77d   :  { %333 = vrot.lane.b32.xlu0 %v330_v31, %s1190_s3  ;;  %v331_v34 = vmul.f32 %v330_v31, %v290_v14  ;;  %v142_v29 = vadd.f32 %v1300_v9, %v141_v28 }
 0x7ef   :  { %v334_v32 = vpop.permute.xlu0 %333 }
 0x7f0   :  { %v336_v33 = vmul.f32 %v334_v32, %v330_v31  ;;  %v1474_v32 = vld [vmem:[%s1618_s6] ss:$0 sm:$0xff] }
 0x7f2   :  { %338 = vrot.lane.b32.xlu1 %v336_v33, %s1191_s28 }
 0x864   :  { %v339_v35 = vpop.permute.xlu1 %338 }
 0x865   :  { %v341_v36 = vadd.f32 %v339_v35, %v331_v34 }
 0x867   :  { %1110 = vtanh.f32 %v341_v36 }
 0x86d   :  { %v1111_v37 = vpop.eup %1110 }
 0x86e   :  { %344 = vrot.lane.b32.xlu2 %v1111_v37, %s1190_s3 }
 0x8c8   :  { %v345_v38 = vpop.permute.xlu2 %344 }
 0x8c9   :  { %v347_v39 = vmul.f32 %v345_v38, %v330_v31 }
 0x8cb   :  { %349 = vrot.lane.b32.xlu0 %v347_v39, %s1191_s28 }
 0x93d   :  { %v350_v41 = vpop.permute.xlu0 %349 }
 0x93e   :  { %352 = vst.msk [vmem:[#allocation2 + $0x18] sm:$0x3] %vm198_vm5, %v350_v41  ;;  %1066 = vmatmul.msk.f32.vlgmr.msrb.gmra.mxu2 %vm50_vm4, %v350_v41 }
 0x93f   :  { %520 = vmatpush.msrb.mxu2 %v1252_v1 }
 0x941   :  { %521 = vmatpush.msrb.mxu2 %v1257_v2 }
 0x943   :  { %522 = vmatpush.msrb.mxu2 %v1269_v5 }
 0x945   :  { %v569_v42 = vld [vmem:[#allocation2 + $0x18] sm:$0xff]  ;;  %523 = vmatpush.msrb.mxu2 %v1277_v6 }
 0x946   :  { %1073 = vmatmul.msk.f32.gmra.mxu3 %vm50_vm4, %v569_v42 }
 0x9c1   :  { %v372_v45 = vpop.f32.mrf.mxu2 }
 0x9c2   :  { %v375_v46 = vadd.f32 %v372_v45, %v136_v44 }
 0x9c4   :  { %v376_v47 = vmul.f32 0.5, %v375_v46 }
 0x9c6   :  { %v377_v48 = vsel %vm1303_vm3, %v375_v46, %v376_v47 }
 0x9c7   :  { %1112 = vtanh.f32 %v377_v48 }
 0x9cd   :  { %v1113_v1 = vpop.eup %1112 }
 0x9ce   :  { %v379_v49 = vmul.f32 0.5, %v1113_v1 }
 0x9d0   :  { %v380_v2 = vadd.f32 0.5, %v379_v49 }
 0x9d2   :  { %v381_v5 = vsel %vm1303_vm3, %v1113_v1, %v380_v2 }
 0x9d3   :  { %384 = vrot.lane.b32.xlu1 %v381_v5, %s1190_s3  ;;  %v382_v51 = vmul.f32 %v381_v5, %v341_v36 }
 0xa45   :  { %v385_v6 = vpop.permute.xlu1 %384 }
 0xa46   :  { %v387_v50 = vmul.f32 %v385_v6, %v381_v5 }
 0xa48   :  { %389 = vrot.lane.b32.xlu2 %v387_v50, %s1191_s28 }
 0xaa2   :  { %v390_v52 = vpop.permute.xlu2 %389 }
 0xaa3   :  { %v392_v53 = vadd.f32 %v390_v52, %v382_v51 }
 0xaa5   :  { %1114 = vtanh.f32 %v392_v53 }
 0xaab   :  { %v1115_v54 = vpop.eup %1114 }
 0xaac   :  { %395 = vrot.lane.b32.xlu0 %v1115_v54, %s1190_s3 }
 0xb1e   :  { %v396_v55 = vpop.permute.xlu0 %395 }
 0xb1f   :  { %v398_v56 = vmul.f32 %v396_v55, %v381_v5 }
 0xb21   :  { %400 = vrot.lane.b32.xlu1 %v398_v56, %s1191_s28 }
 0xb93   :  { %v401_v58 = vpop.permute.xlu1 %400 }
 0xb94   :  { %403 = vst.msk [vmem:[#allocation2 + $0x20] sm:$0x3] %vm198_vm5, %v401_v58  ;;  %1067 = vmatmul.msk.f32.vlgmr.msra.gmra.mxu2 %vm50_vm4, %v401_v58 }
 0xb95   :  { %703 = vmatpush.msra.mxu2 %v1442_v22 }
 0xb97   :  { %704 = vmatpush.msra.mxu2 %v1444_v23 }
 0xb99   :  { %705 = vmatpush.msra.mxu2 %v1448_v24 }
 0xb9b   :  { %v570_v59 = vld [vmem:[#allocation2 + $0x20] sm:$0xff]  ;;  %706 = vmatpush.msra.mxu2 %v1452_v25 }
 0xb9c   :  { %1074 = vmatmul.msk.f32.gmra.mxu3 %vm50_vm4, %v570_v59 }
 0xc17   :  { %v423_v62 = vpop.f32.mrf.mxu2 }
 0xc18   :  { %v426_v63 = vadd.f32 %v423_v62, %v139_v61 }
 0xc1a   :  { %v427_v0 = vmul.f32 0.5, %v426_v63 }
 0xc1c   :  { %v428_v3 = vsel %vm1303_vm3, %v426_v63, %v427_v0 }
 0xc1d   :  { %1116 = vtanh.f32 %v428_v3 }
 0xc23   :  { %v1117_v4 = vpop.eup %1116 }
 0xc24   :  { %v430_v8 = vmul.f32 0.5, %v1117_v4 }
 0xc26   :  { %v431_v10 = vadd.f32 0.5, %v430_v8 }
 0xc28   :  { %v432_v11 = vsel %vm1303_vm3, %v1117_v4, %v431_v10 }
 0xc29   :  { %435 = vrot.lane.b32.xlu2 %v432_v11, %s1190_s3  ;;  %v433_v14 = vmul.f32 %v432_v11, %v392_v53 }
 0xc83   :  { %v436_v12 = vpop.permute.xlu2 %435 }
 0xc84   :  { %v438_v13 = vmul.f32 %v436_v12, %v432_v11 }
 0xc86   :  { %440 = vrot.lane.b32.xlu0 %v438_v13, %s1191_s28 }
 0xcf8   :  { %v441_v16 = vpop.permute.xlu0 %440 }
 0xcf9   :  { %v1433_v17 = vadd.f32 %v441_v16, %v433_v14 }
 0xcfb   :  { %1118 = vtanh.f32 %v1433_v17 }
 0xd01   :  { %v1119_v18 = vpop.eup %1118 }
 0xd02   :  { %446 = vrot.lane.b32.xlu1 %v1119_v18, %s1190_s3 }
 0xd74   :  { %v447_v20 = vpop.permute.xlu1 %446 }
 0xd75   :  { %v449_v21 = vmul.f32 %v447_v20, %v432_v11 }
 0xd77   :  { %451 = vrot.lane.b32.xlu2 %v449_v21, %s1191_s28 }
 0xdd1   :  { %v452_v26 = vpop.permute.xlu2 %451 }
 0xdd2   :  { %454 = vst.msk [vmem:[#allocation2 + $0x28] sm:$0x3] %vm198_vm5, %v452_v26  ;;  %1068 = vmatmul.msk.f32.vlgmr.msrb.gmra.mxu1 %vm50_vm4, %v452_v26 }
 0xdd3   :  { %752 = vmatpush.msrb.mxu1 %v1442_v22 }
 0xdd5   :  { %753 = vmatpush.msrb.mxu1 %v1444_v23 }
 0xdd7   :  { %754 = vmatpush.msrb.mxu1 %v1448_v24 }
 0xdd9   :  { %v571_v27 = vld [vmem:[#allocation2 + $0x28] sm:$0xff]  ;;  %755 = vmatpush.msrb.mxu1 %v1452_v25 }
 0xdda   :  { %1075 = vmatmul.msk.f32.gmra.mxu3 %vm50_vm4, %v571_v27  ;;  %658 = vmatmul.f32.vlgmr.msra.gmra.mxu1 %v1189_v7  ;;  %v618_v7 = vpop.f32.mrf.mxu3 }
 0xddb   :  { %850 = vmatpush.msra.mxu1 %v1442_v22  ;;  %v619_v35 = vadd.f32 %v1474_v32, %v618_v7 }
 0xddd   :  { %851 = vmatpush.msra.mxu1 %v1444_v23 }
 0xddf   :  { %852 = vmatpush.msra.mxu1 %v1448_v24 }
 0xde1   :  { %853 = vmatpush.msra.mxu1 %v1452_v25 }
 0xde2   :  { %v621_v3 = vpop.f32.mrf.mxu3 }
 0xde3   :  { %v622_v4 = vadd.f32 %v1474_v32, %v621_v3 }
 0xe4f   :  { %v474_v30 = vpop.f32.mrf.mxu1 }
 0xe50   :  { %v477_v31 = vadd.f32 %v474_v30, %v142_v29 }
 0xe52   :  { %v478_v33 = vmul.f32 0.5, %v477_v31 }
 0xe54   :  { %v479_v34 = vsel %vm1303_vm3, %v477_v31, %v478_v33  ;;  %v624_v31 = vpop.f32.mrf.mxu3 }
 0xe55   :  { %1120 = vtanh.f32 %v479_v34  ;;  %v625_v33 = vadd.f32 %v1474_v32, %v624_v31 }
 0xe57   :  { %v659_v36 = vpop.f32.mrf.mxu1 }
 0xe58   :  { %v662_v37 = vadd.f32 %v659_v36, %v619_v35 }
 0xe5a   :  { %v663_v38 = vmul.f32 0.5, %v662_v37 }
 0xe5b   :  { %v1121_v39 = vpop.eup %1120 }
 0xe5c   :  { %v664_v40 = vsel %vm1303_vm3, %v662_v37, %v663_v38  ;;  %v481_v41 = vmul.f32 0.5, %v1121_v39 }
 0xe5d   :  { %1122 = vtanh.f32 %v664_v40 }
 0xe5e   :  { %v482_v42 = vadd.f32 0.5, %v481_v41 }
 0xe60   :  { %v483_v43 = vsel %vm1303_vm3, %v1121_v39, %v482_v42 }
 0xe61   :  { %486 = vrot.lane.b32.xlu0 %v483_v43, %s1190_s3  ;;  %v484_v5 = vmul.f32 %v483_v43, %v1433_v17 }
 0xe63   :  { %v1123_v44 = vpop.eup %1122 }
 0xe64   :  { %v666_v45 = vmul.f32 0.5, %v1123_v44 }
 0xe66   :  { %v667_v46 = vadd.f32 0.5, %v666_v45 }
 0xe68   :  { %v668_v47 = vsel %vm1303_vm3, %v1123_v44, %v667_v46 }
 0xe69   :  { %671 = vrot.lane.b32.xlu1 %v668_v47, %s1190_s3  ;;  %v669_v52 = vmul.f32 0.0, %v668_v47 }
 0xed3   :  { %v487_v48 = vpop.permute.xlu0 %486 }
 0xed4   :  { %v489_v1 = vmul.f32 %v487_v48, %v483_v43 }
 0xed6   :  { %491 = vrot.lane.b32.xlu2 %v489_v1, %s1191_s28 }
 0xedb   :  { %v672_v49 = vpop.permute.xlu1 %671 }
 0xedc   :  { %v674_v2 = vmul.f32 %v672_v49, %v668_v47  ;;  %v627_v49 = vpop.f32.mrf.mxu3 }
 0xede   :  { %676 = vrot.lane.b32.xlu0 %v674_v2, %s1191_s28  ;;  %v628_v2 = vadd.f32 %v1474_v32, %v627_v49 }
 0xf30   :  { %v492_v6 = vpop.permute.xlu2 %491 }
 0xf31   :  { %v1490_v50 = vadd.f32 %v492_v6, %v484_v5 }
 0xf33   :  { %1124 = vtanh.f32 %v1490_v50 }
 0xf39   :  { %v1125_v51 = vpop.eup %1124 }
 0xf3a   :  { %497 = vrot.lane.b32.xlu1 %v1125_v51, %s1190_s3 }
 0xf50   :  { %v677_v53 = vpop.permute.xlu0 %676 }
 0xf51   :  { %v679_v54 = vadd.f32 %v677_v53, %v669_v52 }
 0xf53   :  { %1126 = vtanh.f32 %v679_v54 }
 0xf59   :  { %v1127_v55 = vpop.eup %1126 }
 0xf5a   :  { %682 = vrot.lane.b32.xlu2 %v1127_v55, %s1190_s3 }
 0xfac   :  { %v498_v56 = vpop.permute.xlu1 %497 }
 0xfad   :  { %v500_v57 = vmul.f32 %v498_v56, %v483_v43 }
 0xfaf   :  { %502 = vrot.lane.b32.xlu0 %v500_v57, %s1191_s28 }
 0xfb4   :  { %v683_v58 = vpop.permute.xlu2 %682 }
 0xfb5   :  { %v685_v59 = vmul.f32 %v683_v58, %v668_v47 }
 0xfb7   :  { %687 = vrot.lane.b32.xlu1 %v685_v59, %s1191_s28 }
0x1021   :  { %v503_v61 = vpop.permute.xlu0 %502 }
0x1022   :  { %505 = vst.msk [vmem:[#allocation2 + $0x30] sm:$0x3] %vm198_vm5, %v503_v61  ;;  %1069 = vmatmul.msk.f32.vlgmr.msrb.gmra.mxu2 %vm50_vm4, %v503_v61 }
0x1023   :  { %801 = vmatpush.msrb.mxu2 %v1442_v22 }
0x1025   :  { %802 = vmatpush.msrb.mxu2 %v1444_v23 }
0x1027   :  { %803 = vmatpush.msrb.mxu2 %v1448_v24 }
0x1029   :  { %v688_v62 = vpop.permute.xlu1 %687  ;;  %v572_v63 = vld [vmem:[#allocation2 + $0x30] sm:$0xff]  ;;  %804 = vmatpush.msrb.mxu2 %v1452_v25 }
0x102a   :  { %1076 = vmatmul.msk.f32.gmra.mxu3 %vm50_vm4, %v572_v63  ;;  %1078 = vmatmul.msk.f32.vlgmr.msra.gmra.mxu2 %vm50_vm4, %v688_v62  ;;  %v630_v62 = vpop.f32.mrf.mxu3 }
0x102b   :  { %899 = vmatpush.msra.mxu2 %v1442_v22  ;;  %v631_v63 = vadd.f32 %v1474_v32, %v630_v62 }
0x102d   :  { %900 = vmatpush.msra.mxu2 %v1444_v23 }
0x102f   :  { %901 = vmatpush.msra.mxu2 %v1448_v24 }
0x1031   :  { %902 = vmatpush.msra.mxu2 %v1452_v25 }
0x10a5   :  { %v1513_v0 = vpop.f32.mrf.mxu2 }
0x10ad   :  { %v708_v8 = vpop.f32.mrf.mxu2 }
0x10ae   :  { %v711_v10 = vadd.f32 %v708_v8, %v622_v4 }
0x10b0   :  { %v712_v11 = vmul.f32 0.5, %v711_v10 }
0x10b2   :  { %v713_v12 = vsel %vm1303_vm3, %v711_v10, %v712_v11 }
0x10b3   :  { %1128 = vtanh.f32 %v713_v12 }
0x10b9   :  { %v1129_v13 = vpop.eup %1128 }
0x10ba   :  { %v715_v14 = vmul.f32 0.5, %v1129_v13 }
0x10bc   :  { %v716_v16 = vadd.f32 0.5, %v715_v14 }
0x10be   :  { %v717_v17 = vsel %vm1303_vm3, %v1129_v13, %v716_v16 }
0x10bf   :  { %720 = vrot.lane.b32.xlu2 %v717_v17, %s1190_s3  ;;  %v718_v20 = vmul.f32 %v717_v17, %v679_v54 }
0x1119   :  { %v721_v18 = vpop.permute.xlu2 %720 }
0x111a   :  { %v723_v19 = vmul.f32 %v721_v18, %v717_v17 }
0x111c   :  { %725 = vrot.lane.b32.xlu0 %v723_v19, %s1191_s28 }
0x118e   :  { %v726_v21 = vpop.permute.xlu0 %725 }
0x118f   :  { %v728_v26 = vadd.f32 %v726_v21, %v718_v20 }
0x1191   :  { %1130 = vtanh.f32 %v728_v26 }
0x1197   :  { %v1131_v27 = vpop.eup %1130 }
0x1198   :  { %731 = vrot.lane.b32.xlu1 %v1131_v27, %s1190_s3 }
0x120a   :  { %v732_v28 = vpop.permute.xlu1 %731 }
0x120b   :  { %v734_v29 = vmul.f32 %v732_v28, %v717_v17 }
0x120d   :  { %736 = vrot.lane.b32.xlu2 %v734_v29, %s1191_s28  ;;  %v633_v29 = vpop.f32.mrf.mxu3 }
0x1267   :  { %v737_v30 = vpop.permute.xlu2 %736 }
0x1268   :  { %1079 = vmatmul.msk.f32.vlgmr.msrb.gmra.mxu1 %vm50_vm4, %v737_v30  ;;  %v634_v30 = vadd.f32 %v1474_v32, %v633_v29 }
0x1269   :  { %948 = vmatpush.msrb.mxu1 %v1442_v22 }
0x126b   :  { %949 = vmatpush.msrb.mxu1 %v1444_v23 }
0x126d   :  { %950 = vmatpush.msrb.mxu1 %v1448_v24 }
0x126f   :  { %951 = vmatpush.msrb.mxu1 %v1452_v25 }
0x12e5   :  { %v757_v7 = vpop.f32.mrf.mxu1 }
0x12e6   :  { %v760_v34 = vadd.f32 %v757_v7, %v625_v33 }
0x12e8   :  { %v761_v35 = vmul.f32 0.5, %v760_v34 }
0x12ea   :  { %v762_v36 = vsel %vm1303_vm3, %v760_v34, %v761_v35 }
0x12eb   :  { %1132 = vtanh.f32 %v762_v36 }
0x12f1   :  { %v1133_v37 = vpop.eup %1132 }
0x12f2   :  { %v764_v38 = vmul.f32 0.5, %v1133_v37 }
0x12f4   :  { %v765_v39 = vadd.f32 0.5, %v764_v38 }
0x12f6   :  { %v766_v40 = vsel %vm1303_vm3, %v1133_v37, %v765_v39  ;;  %v144_v39 = vpop.f32.mrf.mxu0 }
0x12f7   :  { %769 = vrot.lane.b32.xlu0 %v766_v40, %s1190_s3  ;;  %v767_v43 = vmul.f32 %v766_v40, %v728_v26 }
0x1369   :  { %v770_v41 = vpop.permute.xlu0 %769 }
0x136a   :  { %v772_v42 = vmul.f32 %v770_v41, %v766_v40 }
0x136c   :  { %774 = vrot.lane.b32.xlu1 %v772_v42, %s1191_s28 }
0x13de   :  { %v775_v44 = vpop.permute.xlu1 %774 }
0x13df   :  { %v777_v45 = vadd.f32 %v775_v44, %v767_v43 }
0x13e1   :  { %1134 = vtanh.f32 %v777_v45 }
0x13e7   :  { %v1135_v46 = vpop.eup %1134 }
0x13e8   :  { %780 = vrot.lane.b32.xlu2 %v1135_v46, %s1190_s3 }
0x1442   :  { %v781_v47 = vpop.permute.xlu2 %780 }
0x1443   :  { %v783_v48 = vmul.f32 %v781_v47, %v766_v40  ;;  %v145_v40 = vadd.f32 %v1300_v9, %v144_v39 }
0x1445   :  { %785 = vrot.lane.b32.xlu0 %v783_v48, %s1191_s28  ;;  %v528_v41 = vadd.f32 %v1513_v0, %v145_v40 }
0x1447   :  { %v529_v42 = vmul.f32 0.5, %v528_v41 }
0x1449   :  { %v530_v43 = vsel %vm1303_vm3, %v528_v41, %v529_v42 }
0x14b7   :  { %v786_v1 = vpop.permute.xlu0 %785 }
0x14b8   :  { %1080 = vmatmul.msk.f32.vlgmr.msrb.gmra.mxu2 %vm50_vm4, %v786_v1 }
0x14b9   :  { %997 = vmatpush.msrb.mxu2 %v1442_v22 }
0x14bb   :  { %998 = vmatpush.msrb.mxu2 %v1444_v23 }
0x14bd   :  { %999 = vmatpush.msrb.mxu2 %v1448_v24 }
0x14bf   :  { %1000 = vmatpush.msrb.mxu2 %v1452_v25 }
0x153b   :  { %v806_v5 = vpop.f32.mrf.mxu2 }
0x153c   :  { %v809_v6 = vadd.f32 %v806_v5, %v628_v2 }
0x153e   :  { %v810_v51 = vmul.f32 0.5, %v809_v6 }
0x1540   :  { %v811_v52 = vsel %vm1303_vm3, %v809_v6, %v810_v51 }
0x1541   :  { %1136 = vtanh.f32 %v811_v52 }
0x1547   :  { %v1137_v53 = vpop.eup %1136 }
0x1548   :  { %v813_v54 = vmul.f32 0.5, %v1137_v53 }
0x154a   :  { %v814_v55 = vadd.f32 0.5, %v813_v54  ;;  %v636_v54 = vpop.f32.mrf.mxu3 }
0x154c   :  { %v815_v22 = vsel %vm1303_vm3, %v1137_v53, %v814_v55  ;;  %v637_v55 = vadd.f32 %v1474_v32, %v636_v54 }
0x154d   :  { %818 = vrot.lane.b32.xlu1 %v815_v22, %s1190_s3  ;;  %v816_v25 = vmul.f32 %v815_v22, %v777_v45 }
0x15bf   :  { %v819_v23 = vpop.permute.xlu1 %818 }
0x15c0   :  { %v821_v24 = vmul.f32 %v819_v23, %v815_v22 }
0x15c2   :  { %823 = vrot.lane.b32.xlu2 %v821_v24, %s1191_s28 }
0x161c   :  { %v824_v56 = vpop.permute.xlu2 %823 }
0x161d   :  { %v826_v57 = vadd.f32 %v824_v56, %v816_v25 }
0x161f   :  { %1138 = vtanh.f32 %v826_v57 }
0x1625   :  { %v1139_v58 = vpop.eup %1138 }
0x1626   :  { %829 = vrot.lane.b32.xlu0 %v1139_v58, %s1190_s3 }
0x1698   :  { %v830_v59 = vpop.permute.xlu0 %829 }
0x1699   :  { %v832_v60 = vmul.f32 %v830_v59, %v815_v22 }
0x169b   :  { %834 = vrot.lane.b32.xlu1 %v832_v60, %s1191_s28 }
0x170d   :  { %v835_v61 = vpop.permute.xlu1 %834 }
0x170e   :  { %1081 = vmatmul.msk.f32.vlgmr.msra.gmra.mxu1 %vm50_vm4, %v835_v61 }
0x178b   :  { %v855_v3 = vpop.f32.mrf.mxu1 }
0x178c   :  { %v858_v4 = vadd.f32 %v855_v3, %v631_v63 }
0x178e   :  { %v859_v8 = vmul.f32 0.5, %v858_v4 }
0x1790   :  { %v860_v10 = vsel %vm1303_vm3, %v858_v4, %v859_v8 }
0x1791   :  { %1140 = vtanh.f32 %v860_v10 }
0x1797   :  { %v1141_v11 = vpop.eup %1140 }
0x1798   :  { %v862_v12 = vmul.f32 0.5, %v1141_v11 }
0x179a   :  { %v863_v13 = vadd.f32 0.5, %v862_v12 }
0x179c   :  { %v864_v14 = vsel %vm1303_vm3, %v1141_v11, %v863_v13 }
0x179d   :  { %867 = vrot.lane.b32.xlu2 %v864_v14, %s1190_s3  ;;  %v865_v18 = vmul.f32 %v864_v14, %v826_v57 }
0x17f7   :  { %v868_v16 = vpop.permute.xlu2 %867 }
0x17f8   :  { %v870_v17 = vmul.f32 %v868_v16, %v864_v14 }
0x17fa   :  { %872 = vrot.lane.b32.xlu0 %v870_v17, %s1191_s28 }
0x186c   :  { %v873_v19 = vpop.permute.xlu0 %872 }
0x186d   :  { %v875_v20 = vadd.f32 %v873_v19, %v865_v18 }
0x186f   :  { %1142 = vtanh.f32 %v875_v20 }
0x1875   :  { %v1143_v21 = vpop.eup %1142 }
0x1876   :  { %878 = vrot.lane.b32.xlu1 %v1143_v21, %s1190_s3 }
0x18e8   :  { %v879_v26 = vpop.permute.xlu1 %878 }
0x18e9   :  { %v881_v27 = vmul.f32 %v879_v26, %v864_v14 }
0x18eb   :  { %883 = vrot.lane.b32.xlu2 %v881_v27, %s1191_s28 }
0x1945   :  { %v884_v28 = vpop.permute.xlu2 %883 }
0x1946   :  { %1082 = vmatmul.msk.f32.vlgmr.msra.gmra.mxu2 %vm50_vm4, %v884_v28 }
0x19c9   :  { %v904_v31 = vpop.f32.mrf.mxu2 }
0x19ca   :  { %v907_v33 = vadd.f32 %v904_v31, %v634_v30 }
0x19cc   :  { %v908_v7 = vmul.f32 0.5, %v907_v33 }
0x19ce   :  { %v909_v34 = vsel %vm1303_vm3, %v907_v33, %v908_v7 }
0x19cf   :  { %1144 = vtanh.f32 %v909_v34  ;;  %v1094_v34 = vld [vmem:[%s1619_s7] ss:$0 sm:$0xff] }
0x19d0   :  { %1146 = vtanh.f32 %v530_v43 }
0x19d5   :  { %v1145_v35 = vpop.eup %1144 }
0x19d6   :  { %v911_v36 = vmul.f32 0.5, %v1145_v35  ;;  %v1147_v44 = vpop.eup %1146 }
0x19d7   :  { %v532_v47 = vmul.f32 0.5, %v1147_v44 }
0x19d8   :  { %v912_v37 = vadd.f32 0.5, %v911_v36 }
0x19d9   :  { %v533_v48 = vadd.f32 0.5, %v532_v47 }
0x19da   :  { %v913_v38 = vsel %vm1303_vm3, %v1145_v35, %v912_v37 }
0x19db   :  { %916 = vrot.lane.b32.xlu0 %v913_v38, %s1190_s3  ;;  %v534_v1 = vsel %vm1303_vm3, %v1147_v44, %v533_v48  ;;  %v914_v9 = vmul.f32 %v913_v38, %v875_v20 }
0x19dc   :  { %v535_v58 = vmul.f32 %v534_v1, %v1490_v50 }
0x1a4d   :  { %v917_v45 = vpop.permute.xlu0 %916 }
0x1a4e   :  { %v919_v46 = vmul.f32 %v917_v45, %v913_v38  ;;  %v1095_v45 = vld [vmem:[#allocation3] ss:$0 sm:$0xff] }
0x1a50   :  { %921 = vrot.lane.b32.xlu1 %v919_v46, %s1191_s28 }
0x1a58   :  { %537 = vrot.lane.b32.xlu1 %v534_v1, %s1190_s3 }
0x1ac2   :  { %v922_v49 = vpop.permute.xlu1 %921 }
0x1ac3   :  { %v924_v0 = vadd.f32 %v922_v49, %v914_v9 }
0x1ac5   :  { %1148 = vtanh.f32 %v924_v0 }
0x1aca   :  { %v538_v51 = vpop.permute.xlu1 %537 }
0x1acb   :  { %v1149_v2 = vpop.eup %1148  ;;  %v540_v52 = vmul.f32 %v538_v51, %v534_v1 }
0x1acc   :  { %927 = vrot.lane.b32.xlu2 %v1149_v2, %s1190_s3 }
0x1b26   :  { %v928_v5 = vpop.permute.xlu2 %927 }
0x1b27   :  { %v930_v6 = vmul.f32 %v928_v5, %v913_v38 }
0x1b29   :  { %932 = vrot.lane.b32.xlu0 %v930_v6, %s1191_s28 }
0x1b31   :  { %542 = vrot.lane.b32.xlu0 %v540_v52, %s1191_s28 }
0x1b9b   :  { %v933_v53 = vpop.permute.xlu0 %932 }
0x1b9c   :  { %1083 = vmatmul.msk.f32.vlgmr.msrb.gmra.mxu1 %vm50_vm4, %v933_v53 }
0x1ba3   :  { %v543_v57 = vpop.permute.xlu0 %542 }
0x1ba4   :  { %v545_v60 = vadd.f32 %v543_v57, %v535_v58 }
0x1c19   :  { %v953_v22 = vpop.f32.mrf.mxu1 }
0x1c1a   :  { %v956_v23 = vadd.f32 %v953_v22, %v637_v55 }
0x1c1c   :  { %v957_v24 = vmul.f32 0.5, %v956_v23 }
0x1c1e   :  { %v958_v25 = vsel %vm1303_vm3, %v956_v23, %v957_v24 }
0x1c1f   :  { %1150 = vtanh.f32 %v958_v25 }
0x1c20   :  { %1152 = vtanh.f32 %v545_v60 }
0x1c25   :  { %v1151_v56 = vpop.eup %1150 }
0x1c26   :  { %v960_v59 = vmul.f32 0.5, %v1151_v56  ;;  %v1153_v63 = vpop.eup %1152 }
0x1c28   :  { %v961_v61 = vadd.f32 0.5, %v960_v59 }
0x1c2a   :  { %v962_v62 = vsel %vm1303_vm3, %v1151_v56, %v961_v61 }
0x1c2b   :  { %965 = vrot.lane.b32.xlu2 %v962_v62, %s1190_s3  ;;  %v963_v50 = vmul.f32 %v962_v62, %v924_v0 }
0x1c33   :  { %548 = vrot.lane.b32.xlu2 %v1153_v63, %s1190_s3 }
0x1c85   :  { %v966_v3 = vpop.permute.xlu2 %965 }
0x1c86   :  { %v968_v4 = vmul.f32 %v966_v3, %v962_v62 }
0x1c88   :  { %970 = vrot.lane.b32.xlu1 %v968_v4, %s1191_s28 }
0x1c8d   :  { %v549_v8 = vpop.permute.xlu2 %548 }
0x1c8e   :  { %v551_v10 = vmul.f32 %v549_v8, %v534_v1 }
0x1c90   :  { %553 = vrot.lane.b32.xlu1 %v551_v10, %s1191_s28 }
0x1cfa   :  { %v971_v11 = vpop.permute.xlu1 %970 }
0x1cfb   :  { %v973_v12 = vadd.f32 %v971_v11, %v963_v50 }
0x1cfd   :  { %1154 = vtanh.f32 %v973_v12 }
0x1d02   :  { %v554_v13 = vpop.permute.xlu1 %553 }
0x1d03   :  { %v1155_v14 = vpop.eup %1154  ;;  %556 = vst.msk [vmem:[#allocation2 + $0x38] sm:$0x3] %vm198_vm5, %v554_v13 }
0x1d04   :  { %976 = vrot.lane.b32.xlu0 %v1155_v14, %s1190_s3 }
0x1d0a   :  { %v573_v16 = vld [vmem:[#allocation2 + $0x38] sm:$0xff] }
0x1d0b   :  { %1077 = vmatmul.msk.f32.gmra.mxu3 %vm50_vm4, %v573_v16 }
0x1d76   :  { %v977_v17 = vpop.permute.xlu0 %976 }
0x1d77   :  { %v979_v18 = vmul.f32 %v977_v17, %v962_v62 }
0x1d79   :  { %981 = vrot.lane.b32.xlu2 %v979_v18, %s1191_s28 }
0x1d8e   :  { %v639_v20 = vpop.f32.mrf.mxu3 }
0x1d8f   :  { %v640_v21 = vadd.f32 %v1474_v32, %v639_v20 }
0x1dd3   :  { %v982_v19 = vpop.permute.xlu2 %981 }
0x1dd4   :  { %1084 = vmatmul.msk.f32.vlgmr.msrb.gmra.mxu2 %vm50_vm4, %v982_v19 }
0x1e57   :  { %v1002_v26 = vpop.f32.mrf.mxu2 }
0x1e58   :  { %v1005_v27 = vadd.f32 %v1002_v26, %v640_v21 }
0x1e5a   :  { %v1006_v28 = vmul.f32 0.5, %v1005_v27 }
0x1e5c   :  { %v1007_v29 = vsel %vm1303_vm3, %v1005_v27, %v1006_v28 }
0x1e5d   :  { %1156 = vtanh.f32 %v1007_v29 }
0x1e63   :  { %v1157_v30 = vpop.eup %1156 }
0x1e64   :  { %v1009_v31 = vmul.f32 0.5, %v1157_v30 }
0x1e66   :  { %v1010_v33 = vadd.f32 0.5, %v1009_v31 }
0x1e68   :  { %v1011_v7 = vsel %vm1303_vm3, %v1157_v30, %v1010_v33 }
0x1e69   :  { %1014 = vrot.lane.b32.xlu0 %v1011_v7, %s1190_s3  ;;  %v1012_v36 = vmul.f32 %v1011_v7, %v973_v12 }
0x1e71   :  { %1032 = vrot.lane.b32.xlu0 %v1094_v34, %s1192_s27 }
0x1edb   :  { %v1015_v32 = vpop.permute.xlu0 %1014 }
0x1edc   :  { %v1017_v35 = vmul.f32 %v1015_v32, %v1011_v7 }
0x1ede   :  { %1019 = vrot.lane.b32.xlu1 %v1017_v35, %s1191_s28 }
0x1ee3   :  { %v1033_v40 = vpop.permute.xlu0 %1032 }
0x1f50   :  { %v1020_v37 = vpop.permute.xlu1 %1019 }
0x1f51   :  { %v1022_v38 = vadd.f32 %v1020_v37, %v1012_v36 }
0x1f53   :  { %1158 = vtanh.f32 %v1022_v38 }
0x1f59   :  { %v1159_v39 = vpop.eup %1158 }
0x1f5a   :  { %1025 = vrot.lane.b32.xlu2 %v1159_v39, %s1190_s3 }
0x1fb4   :  { %v1026_v15 = vpop.permute.xlu2 %1025 }
0x1fb5   :  { %v1028_v41 = vmul.f32 %v1026_v15, %v1011_v7 }
0x1fb7   :  { %v1035_v42 = vmul.f32 %v1033_v40, %v1028_v41 }
0x1fb9   :  { %1037 = vrot.lane.b32.xlu1 %v1035_v42, %s1191_s28 }
0x202b   :  { %v1038_v43 = vpop.permute.xlu1 %1037 }
0x202c   :  { %v1040_v44 = vsel %vm198_vm5, %v1038_v43, 0.0 }
0x202d   :  { %1041 = vadd.xlane.f32.xlu2 %v1040_v44 }
0x20a0   :  { %v1042_v46 = vpop.xlane.xlu2 %1041 }
0x20a1   :  { %v1047_v47 = vadd.f32 %v1095_v45, %v1042_v46 }
0x20a3   :  { %1049 = vst.msk [vmem:[%s1621_s9] sm:$0x3] %vm1048_vm6, %v1047_v47 }
0x20a4   :  { %1054 = vsyncpa [#allocation5], 1 }

</bundles_post_ra>
